<compile_context>
chip_gen: v5e
topology: v5e:2x2
jax: 0.10.0
libtpu: 0.0.40
codegen_flags: <defaults>
</compile_context>

<pallas_src>
import functools

import numpy as np

import jax
import jax.numpy as jnp
from jax.experimental import pallas as pl
from jax.experimental.pallas import tpu as pltpu

LANE = 128
_VMEM_LIMIT = None  # resolved lazily via get_tpu_info


def _round_up(x, m):
    return ((x + m - 1) // m) * m


def _pick_tiles(n_pad):
    # Big streaming tiles when divisibility allows (v5e/v6e measured 512/1024
    # near HBM roofline); fall back to 128 for small graphs.
    if n_pad % 512 == 0:
        tm = 512
    elif n_pad % 256 == 0:
        tm = 256
    else:
        tm = 128
    if n_pad % 1024 == 0:
        tk = 1024
    elif n_pad % 512 == 0:
        tk = 512
    elif n_pad % 256 == 0:
        tk = 256
    else:
        tk = 128
    return tm, tk


def _vmem_limit_bytes():
    # 3/4 of physical VMEM, capped at 96 MiB: v5e/v6e (128 MiB) -> 96 MiB,
    # v7x (64 MiB) -> 48 MiB. Conservative 32 MiB if the query fails.
    try:
        cap = int(pltpu.get_tpu_info().vmem_capacity_bytes)
        return min((cap * 3) // 4, 96 * 1024 * 1024)
    except Exception:
        return 32 * 1024 * 1024


def _cparams(sem):
    global _VMEM_LIMIT
    if _VMEM_LIMIT is None:
        _VMEM_LIMIT = _vmem_limit_bytes()
    return pltpu.CompilerParams(dimension_semantics=sem,
                                vmem_limit_bytes=_VMEM_LIMIT)


# --------------------------------------------------------------------------
# Kernel 1: feature transform  out = X @ W   (tiled over node rows, W resident)
# --------------------------------------------------------------------------
def _xw_kernel(x_ref, w_ref, out_ref):
    out_ref[...] = jnp.dot(x_ref[...], w_ref[...],
                           preferred_element_type=jnp.float32).astype(out_ref.dtype)


def _feature_transform(x, w, *, tm):
    n_pad, fin = x.shape
    fout = w.shape[1]
    # TODO(synk): for very large fin (e.g. 5000-d text features) add a k-axis
    #             over fin with an f32 acc scratch instead of shrinking tm.
    return pl.pallas_call(
        _xw_kernel,
        grid=(n_pad // tm,),
        in_specs=[pl.BlockSpec((tm, fin), lambda i: (i, 0)),
                  pl.BlockSpec((fin, fout), lambda i: (0, 0))],   # W resident
        out_specs=pl.BlockSpec((tm, fout), lambda i: (i, 0)),
        out_shape=jax.ShapeDtypeStruct((n_pad, fout), jnp.bfloat16),
        compiler_params=_cparams(("parallel",)),
    )(x, w)


# --------------------------------------------------------------------------
# Kernel 2: GCN propagation  out = [relu](A_hat @ XW + b)
#   grid = (row tiles, scheduled k-tiles). The scalar-prefetched schedule
#   visits only k-tiles that overlap a graph block for this row tile; padding
#   steps repeat the previous block index (DMA elided) and skip compute.
# --------------------------------------------------------------------------
def _propagate_kernel(ksched_ref, kcount_ref, a_ref, xw_ref, b_ref, out_ref,
                      acc_ref, *, apply_relu):
    i = pl.program_id(0)
    j = pl.program_id(1)

    @pl.when(j == 0)
    def _():
        acc_ref[...] = jnp.zeros_like(acc_ref)

    @pl.when(j < kcount_ref[i])            # skip schedule-padding steps
    def _():
        acc_ref[...] += jnp.dot(a_ref[...], xw_ref[...],
                                preferred_element_type=jnp.float32)

    @pl.when(j == pl.num_programs(1) - 1)
    def _():
        out = acc_ref[...] + b_ref[...]
        if apply_relu:
            out = jnp.maximum(out, 0.0)
        out_ref[...] = out.astype(out_ref.dtype)


def _propagate(k_sched, k_count, a, xw, b, *, tm, tk, max_steps, apply_relu,
               out_dtype):
    n_pad = a.shape[0]
    f = xw.shape[1]
    nm = n_pad // tm
    kernel = functools.partial(_propagate_kernel, apply_relu=apply_relu)

    def a_map(i, j, ks, kc):
        return (i, ks[i * max_steps + j])

    def xw_map(i, j, ks, kc):
        return (ks[i * max_steps + j], 0)

    grid_spec = pltpu.PrefetchScalarGridSpec(
        num_scalar_prefetch=2,
        grid=(nm, max_steps),
        in_specs=[pl.BlockSpec((tm, tk), a_map),                       # A_hat stream
                  pl.BlockSpec((tk, f), xw_map),                       # XW streamed per k
                  pl.BlockSpec((1, f), lambda i, j, ks, kc: (0, 0))],  # bias resident
        out_specs=pl.BlockSpec((tm, f), lambda i, j, ks, kc: (i, 0)),
        scratch_shapes=[pltpu.VMEM((tm, f), jnp.float32)],
    )
    return pl.pallas_call(
        kernel,
        grid_spec=grid_spec,
        out_shape=jax.ShapeDtypeStruct((n_pad, f), out_dtype),
        compiler_params=_cparams(("parallel", "arbitrary")),
    )(k_sched, k_count, a, xw, b)


# --------------------------------------------------------------------------
# Kernel 3: fused mean pooling  out = P @ [x3 | root2]
#   Accumulates straight into the resident f32 output block (no scratch,
#   no per-step concatenate). P kept f32 for parity with the reference.
# --------------------------------------------------------------------------
def _pool_kernel(p_ref, y_ref, out_ref):
    @pl.when(pl.program_id(0) == 0)
    def _():
        out_ref[...] = jnp.zeros_like(out_ref)
    out_ref[...] += jnp.dot(p_ref[...], y_ref[...].astype(jnp.float32),
                            preferred_element_type=jnp.float32)


def _pool(p, y, *, tk):
    g_pad, n_pad = p.shape
    f = y.shape[1]
    return pl.pallas_call(
        _pool_kernel,
        grid=(n_pad // tk,),
        in_specs=[pl.BlockSpec((g_pad, tk), lambda k: (0, k)),
                  pl.BlockSpec((tk, f), lambda k: (k, 0))],
        out_specs=pl.BlockSpec((g_pad, f), lambda k: (0, 0)),
        out_shape=jax.ShapeDtypeStruct((g_pad, f), jnp.float32),
        compiler_params=_cparams(("arbitrary",)),
    )(p, y)


# --------------------------------------------------------------------------
# Jitted core: padding, dense BU adjacency (bf16, built padded), two GCN
# layers, root_extend gathers and fused mean pooling.
# --------------------------------------------------------------------------
@functools.partial(jax.jit,
                   static_argnames=("num_graphs", "n", "n_pad", "tm", "tk",
                                    "max_steps"))
def _bu_rumor_gcn_core(x, edge_index, batch, k_sched, k_count, params, *,
                       num_graphs, n, n_pad, tm, tk, max_steps):
    x = x.astype(jnp.float32)
    fin = x.shape[1]
    w1, b1, w2, b2 = params["W1"], params["b1"], params["W2"], params["b2"]
    fhid, fout = w1.shape[1], w2.shape[1]
    fin_p, fhid_p, fout_p = (_round_up(f, LANE) for f in (fin, fhid, fout))
    g_pad = _round_up(max(num_graphs, 8), 8)

    # BU_edge_index = edge_index.flip([0]): messages flow edge_index[1] -> [0].
    bu_src = edge_index[1]
    bu_dst = edge_index[0]

    # ---- normalized BU adjacency, scattered straight into a padded bf16 buffer
    deg = jnp.ones((n,), jnp.float32).at[bu_dst].add(1.0)   # in-degree + self loop
    dinv = jax.lax.rsqrt(deg)
    edge_w = (dinv[bu_dst] * dinv[bu_src]).astype(jnp.bfloat16)
    diag_w = (dinv * dinv).astype(jnp.bfloat16)
    idx = jnp.arange(n)
    a_p = (jnp.zeros((n_pad, n_pad), jnp.bfloat16)
           .at[bu_dst, bu_src].add(edge_w)
           .at[idx, idx].add(diag_w))
    # TODO(synk): build A_hat tiles sparsely / on the fly for large N instead
    #             of this dense materialization.

    # ---- scatter_mean operator + root gather indices ---------------------------
    onehot = (batch[None, :] == jnp.arange(num_graphs)[:, None]).astype(jnp.float32)
    root_index = jnp.argmax(onehot, axis=1)   # first node of each graph
    # TODO(synk): PyTorch uses data.root_index when provided; here the root is
    #             assumed to be the first node of each graph (reference fallback).
    root_of_node = root_index[batch].astype(jnp.int32)
    counts = jnp.maximum(onehot.sum(axis=1), 1.0)
    pool = onehot / counts[:, None]
    p_p = jnp.zeros((g_pad, n_pad), jnp.float32).at[:num_graphs, :n].set(pool)
    root_p = jnp.zeros((n_pad,), jnp.int32).at[:n].set(root_of_node)

    # ---- lane-dense padded inputs / weights ------------------------------------
    x_bf = jnp.zeros((n_pad, fin_p), jnp.bfloat16).at[:n, :fin].set(x.astype(jnp.bfloat16))
    w1_p = jnp.zeros((fin_p, fhid_p), jnp.bfloat16).at[:fin, :fhid].set(w1.astype(jnp.bfloat16))
    b1_p = jnp.zeros((1, fhid_p), jnp.float32).at[0, :fhid].set(b1)
    # conv2 consumes [x2 | root1] laid out on a (fhid_p + fin_p)-wide lane axis.
    w2_p = jnp.zeros((fhid_p + fin_p, fout_p), jnp.bfloat16)
    w2_p = w2_p.at[:fhid, :fout].set(w2[:fhid].astype(jnp.bfloat16))
    w2_p = w2_p.at[fhid_p:fhid_p + fin, :fout].set(w2[fhid:fhid + fin].astype(jnp.bfloat16))
    b2_p = jnp.zeros((1, fout_p), jnp.float32).at[0, :fout].set(b2)

    # ---- conv1: x2 = A_hat @ (x @ W1) + b1  (pre-ReLU, kept for root_extend) ---
    xw1 = _feature_transform(x_bf, w1_p, tm=tm)
    x2 = _propagate(k_sched, k_count, a_p, xw1, b1_p, tm=tm, tk=tk,
                    max_steps=max_steps, apply_relu=False, out_dtype=jnp.bfloat16)

    # ---- root_extend: O(N*F) row gathers ----------------------------------------
    root1 = x_bf[root_p]                 # x1[root(batch[i])]
    root2 = x2[root_p]                   # x2[root(batch[i])], pre-ReLU
    h = jnp.maximum(jnp.concatenate([x2, root1], axis=1), 0)
    # TODO(synk): F.dropout(p=0.2) is identity in eval mode; training RNG mask
    #             not implemented.

    # ---- conv2: x3 = relu(A_hat @ (h @ W2) + b2) --------------------------------
    xw2 = _feature_transform(h, w2_p, tm=tm)
    x3 = _propagate(k_sched, k_count, a_p, xw2, b2_p, tm=tm, tk=tk,
                    max_steps=max_steps, apply_relu=True, out_dtype=jnp.bfloat16)

    # ---- fused scatter_mean of [x3 | root2] over graphs -------------------------
    y = jnp.concatenate([x3, root2], axis=1)          # single lane-dense slab
    pooled = _pool(p_p, y, tk=tk)

    return jnp.concatenate(
        [pooled[:num_graphs, :fout], pooled[:num_graphs, fout_p:fout_p + fhid]],
        axis=1)


# --------------------------------------------------------------------------
# Public entry: host glue computes the per-row-tile active k-tile schedule
# (needs concrete edge_index; O(E + N), cache per mini-batch), then dispatches
# the jitted device core.
# --------------------------------------------------------------------------
def bu_rumor_gcn(x, edge_index, batch, num_graphs, params):
    """BUrumorGCN.forward (inference). `num_graphs` must be a Python int."""
    n = int(x.shape[0])
    n_pad = _round_up(max(n, 8), LANE)
    if n_pad >= 512:
        n_pad = _round_up(n_pad, 512)
    tm, tk = _pick_tiles(n_pad)
    nm, nk = n_pad // tm, n_pad // tk

    ei = np.asarray(jax.device_get(edge_index))
    tiles = np.zeros((nm, nk), dtype=bool)
    tiles[ei[0] // tm, ei[1] // tk] = True            # A row = dst, col = src
    nodes = np.arange(n)
    tiles[nodes // tm, nodes // tk] = True            # self-loop diagonal
    k_count = tiles.sum(axis=1).astype(np.int32)
    max_steps = max(int(k_count.max()), 1)
    k_sched = np.zeros((nm, max_steps), dtype=np.int32)
    for i in range(nm):
        cols = np.nonzero(tiles[i])[0]
        if cols.size:
            k_sched[i, :cols.size] = cols
            k_sched[i, cols.size:] = cols[-1]         # repeated index -> DMA elided
    k_sched = jnp.asarray(k_sched.reshape(-1))        # 1-D keeps SMEM padding small
    k_count = jnp.asarray(k_count)

    return _bu_rumor_gcn_core(x, edge_index, batch, k_sched, k_count, params,
                              num_graphs=int(num_graphs), n=n, n_pad=n_pad,
                              tm=tm, tk=tk, max_steps=max_steps)


def init_params(key, in_feats, hid_feats, out_feats):
    k1, k2 = jax.random.split(key)

    def glorot(k, fan_in, fan_out):
        lim = jnp.sqrt(6.0 / (fan_in + fan_out))
        return jax.random.uniform(k, (fan_in, fan_out), jnp.float32, -lim, lim)

    return {"W1": glorot(k1, in_feats, hid_feats),
            "b1": jnp.zeros((hid_feats,), jnp.float32),
            "W2": glorot(k2, hid_feats + in_feats, out_feats),
            "b2": jnp.zeros((out_feats,), jnp.float32)}


if __name__ == "__main__":
    key = jax.random.PRNGKey(0)
    k_x, k_p = jax.random.split(key)

    # Small synthetic batch: 2 graphs x 8 nodes, chain edges (root -> child).
    n_nodes, in_feats, hid_feats, out_feats = 16, 8, 16, 16
    nodes_per_graph = 8
    num_graphs = n_nodes // nodes_per_graph

    x = jax.random.normal(k_x, (n_nodes, in_feats), jnp.float32)
    src, dst = [], []
    for g in range(num_graphs):
        base = g * nodes_per_graph
        for k in range(nodes_per_graph - 1):
            src.append(base + k)
            dst.append(base + k + 1)
    edge_index = jnp.array([src, dst], dtype=jnp.int32)     # (2, E) top-down edges
    batch = jnp.repeat(jnp.arange(num_graphs, dtype=jnp.int32), nodes_per_graph)

    params = init_params(k_p, in_feats, hid_feats, out_feats)

    out = bu_rumor_gcn(x, edge_index, batch, num_graphs, params)
    jax.block_until_ready(out)
    assert out.shape == (num_graphs, out_feats + hid_feats)
    print("KERNEL_OK")
</pallas_src>

<mosaic_0001>
module attributes {stable_mosaic.version = 11 : i64} {
  func.func @_xw_kernel(%arg0: i32, %arg1: memref<128x128xbf16, #tpu.memory_space<vmem>>, %arg2: memref<128x128xbf16, #tpu.memory_space<vmem>>, %arg3: memref<128x128xbf16, #tpu.memory_space<vmem>>) attributes {dimension_semantics = [#tpu.dimension_semantics<parallel>], iteration_bounds = array<i64: 1>, scalar_prefetch = 0 : i64, scratch_operands = 0 : i64, tpu.core_type = #tpu.core_type<tc>, window_params = [{transform_indices = @transform_0, window_bounds = array<i64: 128, 128>}, {pipeline_mode = #tpu.pipeline_mode<synchronous>, transform_indices = @transform_1, window_bounds = array<i64: 128, 128>}, {transform_indices = @transform_2, window_bounds = array<i64: 128, 128>}]} {
    %c0 = arith.constant 0 : index
    %c0_0 = arith.constant 0 : index
    %0 = vector.load %arg1[%c0, %c0_0] : memref<128x128xbf16, #tpu.memory_space<vmem>>, vector<128x128xbf16>
    %c0_1 = arith.constant 0 : index
    %c0_2 = arith.constant 0 : index
    %1 = vector.load %arg2[%c0_1, %c0_2] : memref<128x128xbf16, #tpu.memory_space<vmem>>, vector<128x128xbf16>
    %cst = arith.constant dense<0.000000e+00> : vector<128x128xf32>
    %2 = tpu.matmul %0, %1, %cst {dimension_numbers = #tpu.dot_dimension_numbers<[1], [0], [0], [1], [0, 0, 1, 1], [], []>} : vector<128x128xbf16>, vector<128x128xbf16>, vector<128x128xf32> -> vector<128x128xf32>
    %3 = arith.truncf %2 : vector<128x128xf32> to vector<128x128xbf16>
    %c0_3 = arith.constant 0 : index
    %c0_4 = arith.constant 0 : index
    %4 = vector.load %arg3[%c0_3, %c0_4] : memref<128x128xbf16, #tpu.memory_space<vmem>>, vector<128x128xbf16>
    tpu.vector_store %arg3[%c0_3, %c0_4], %3 {strides = array<i32>} : memref<128x128xbf16, #tpu.memory_space<vmem>>, vector<128x128xbf16>,
    return
  }
  func.func @transform_0(%arg0: i32) -> (i32, i32) {
    %c0_i32 = arith.constant 0 : i32
    %c0_i32_0 = arith.constant 0 : i32
    return %arg0, %c0_i32 : i32, i32
  }
  func.func @transform_1(%arg0: i32) -> (i32, i32) {
    %c0_i32 = arith.constant 0 : i32
    %c0_i32_0 = arith.constant 0 : i32
    %c0_i32_1 = arith.constant 0 : i32
    return %c0_i32, %c0_i32_0 : i32, i32
  }
  func.func @transform_2(%arg0: i32) -> (i32, i32) {
    %c0_i32 = arith.constant 0 : i32
    %c0_i32_0 = arith.constant 0 : i32
    return %arg0, %c0_i32 : i32, i32
  }
}

module attributes {stable_mosaic.version = 11 : i64} {
  func.func @_propagate_kernel(%arg0: i32, %arg1: i32, %arg2: memref<1xi32, #tpu.memory_space<smem>>, %arg3: memref<1xi32, #tpu.memory_space<smem>>, %arg4: memref<128x128xbf16, #tpu.memory_space<vmem>>, %arg5: memref<128x128xbf16, #tpu.memory_space<vmem>>, %arg6: memref<1x128xf32, #tpu.memory_space<vmem>>, %arg7: memref<128x128xbf16, #tpu.memory_space<vmem>>, %arg8: memref<128x128xf32, #tpu.memory_space<vmem>>) attributes {dimension_semantics = [#tpu.dimension_semantics<parallel>, #tpu.dimension_semantics<arbitrary>], iteration_bounds = array<i64: 1, 1>, scalar_prefetch = 2 : i64, scratch_operands = 1 : i64, tpu.core_type = #tpu.core_type<tc>, window_params = [{transform_indices = @transform_0, window_bounds = array<i64: 128, 128>}, {transform_indices = @transform_1, window_bounds = array<i64: 128, 128>}, {pipeline_mode = #tpu.pipeline_mode<synchronous>, transform_indices = @transform_2, window_bounds = array<i64: 1, 128>}, {transform_indices = @transform_3, window_bounds = array<i64: 128, 128>}]} {
    %c0_i32 = arith.constant 0 : i32
    %0 = arith.cmpi eq, %arg1, %c0_i32 : i32
    %1 = arith.extui %0 : i1 to i32
    %c0_i32_0 = arith.constant 0 : i32
    %2 = arith.cmpi ne, %1, %c0_i32_0 : i32
    scf.if %2 {
      %cst = arith.constant 0.000000e+00 : f32
      %11 = vector.broadcast %cst : f32 to vector<128x128xf32>
      %c0 = arith.constant 0 : index
      %c0_4 = arith.constant 0 : index
      %12 = vector.load %arg8[%c0, %c0_4] : memref<128x128xf32, #tpu.memory_space<vmem>>, vector<128x128xf32>
      tpu.vector_store %arg8[%c0, %c0_4], %11 {strides = array<i32>} : memref<128x128xf32, #tpu.memory_space<vmem>>, vector<128x128xf32>,
    } else {
    }
    %3 = arith.index_cast %arg0 : i32 to index
    %4 = memref.load %arg3[%3] : memref<1xi32, #tpu.memory_space<smem>>
    %5 = arith.cmpi slt, %arg1, %4 : i32
    %6 = arith.extui %5 : i1 to i32
    %c0_i32_1 = arith.constant 0 : i32
    %7 = arith.cmpi ne, %6, %c0_i32_1 : i32
    scf.if %7 {
      %c0 = arith.constant 0 : index
      %c0_4 = arith.constant 0 : index
      %11 = vector.load %arg8[%c0, %c0_4] : memref<128x128xf32, #tpu.memory_space<vmem>>, vector<128x128xf32>
      %c0_5 = arith.constant 0 : index
      %c0_6 = arith.constant 0 : index
      %12 = vector.load %arg4[%c0_5, %c0_6] : memref<128x128xbf16, #tpu.memory_space<vmem>>, vector<128x128xbf16>
      %c0_7 = arith.constant 0 : index
      %c0_8 = arith.constant 0 : index
      %13 = vector.load %arg5[%c0_7, %c0_8] : memref<128x128xbf16, #tpu.memory_space<vmem>>, vector<128x128xbf16>
      %cst = arith.constant dense<0.000000e+00> : vector<128x128xf32>
      %14 = tpu.matmul %12, %13, %cst {dimension_numbers = #tpu.dot_dimension_numbers<[1], [0], [0], [1], [0, 0, 1, 1], [], []>} : vector<128x128xbf16>, vector<128x128xbf16>, vector<128x128xf32> -> vector<128x128xf32>
      %15 = arith.addf %11, %14 : vector<128x128xf32>
      %c0_9 = arith.constant 0 : index
      %c0_10 = arith.constant 0 : index
      %16 = vector.load %arg8[%c0_9, %c0_10] : memref<128x128xf32, #tpu.memory_space<vmem>>, vector<128x128xf32>
      tpu.vector_store %arg8[%c0_9, %c0_10], %15 {strides = array<i32>} : memref<128x128xf32, #tpu.memory_space<vmem>>, vector<128x128xf32>,
    } else {
    }
    %c0_i32_2 = arith.constant 0 : i32
    %8 = arith.cmpi eq, %arg1, %c0_i32_2 : i32
    %9 = arith.extui %8 : i1 to i32
    %c0_i32_3 = arith.constant 0 : i32
    %10 = arith.cmpi ne, %9, %c0_i32_3 : i32
    scf.if %10 {
      %c0 = arith.constant 0 : index
      %c0_4 = arith.constant 0 : index
      %11 = vector.load %arg8[%c0, %c0_4] : memref<128x128xf32, #tpu.memory_space<vmem>>, vector<128x128xf32>
      %c0_5 = arith.constant 0 : index
      %c0_6 = arith.constant 0 : index
      %12 = vector.load %arg6[%c0_5, %c0_6] : memref<1x128xf32, #tpu.memory_space<vmem>>, vector<1x128xf32>
      %13 = vector.broadcast %12 : vector<1x128xf32> to vector<128x128xf32>
      %14 = arith.addf %11, %13 : vector<128x128xf32>
      %15 = arith.truncf %14 : vector<128x128xf32> to vector<128x128xbf16>
      %c0_7 = arith.constant 0 : index
      %c0_8 = arith.constant 0 : index
      %16 = vector.load %arg7[%c0_7, %c0_8] : memref<128x128xbf16, #tpu.memory_space<vmem>>, vector<128x128xbf16>
      tpu.vector_store %arg7[%c0_7, %c0_8], %15 {strides = array<i32>} : memref<128x128xbf16, #tpu.memory_space<vmem>>, vector<128x128xbf16>,
    } else {
    }
    return
  }
  func.func @transform_0(%arg0: i32, %arg1: i32, %arg2: memref<1xi32, #tpu.memory_space<smem>>, %arg3: memref<1xi32, #tpu.memory_space<smem>>) -> (i32, i32) {
    %c1_i32 = arith.constant 1 : i32
    %0 = arith.muli %arg0, %c1_i32 : i32
    %1 = arith.addi %0, %arg1 : i32
    %2 = arith.index_cast %1 : i32 to index
    %3 = memref.load %arg2[%2] : memref<1xi32, #tpu.memory_space<smem>>
    %c0_i32 = arith.constant 0 : i32
    return %arg0, %3 : i32, i32
  }
  func.func @transform_1(%arg0: i32, %arg1: i32, %arg2: memref<1xi32, #tpu.memory_space<smem>>, %arg3: memref<1xi32, #tpu.memory_space<smem>>) -> (i32, i32) {
    %c1_i32 = arith.constant 1 : i32
    %0 = arith.muli %arg0, %c1_i32 : i32
    %1 = arith.addi %0, %arg1 : i32
    %2 = arith.index_cast %1 : i32 to index
    %3 = memref.load %arg2[%2] : memref<1xi32, #tpu.memory_space<smem>>
    %c0_i32 = arith.constant 0 : i32
    %c0_i32_0 = arith.constant 0 : i32
    return %3, %c0_i32 : i32, i32
  }
  func.func @transform_2(%arg0: i32, %arg1: i32, %arg2: memref<1xi32, #tpu.memory_space<smem>>, %arg3: memref<1xi32, #tpu.memory_space<smem>>) -> (i32, i32) {
    %c0_i32 = arith.constant 0 : i32
    %c0_i32_0 = arith.constant 0 : i32
    %c0_i32_1 = arith.constant 0 : i32
    return %c0_i32, %c0_i32_0 : i32, i32
  }
  func.func @transform_3(%arg0: i32, %arg1: i32, %arg2: memref<1xi32, #tpu.memory_space<smem>>, %arg3: memref<1xi32, #tpu.memory_space<smem>>) -> (i32, i32) {
    %c0_i32 = arith.constant 0 : i32
    %c0_i32_0 = arith.constant 0 : i32
    return %arg0, %c0_i32 : i32, i32
  }
}

module attributes {stable_mosaic.version = 11 : i64} {
  func.func @_xw_kernel(%arg0: i32, %arg1: memref<128x256xbf16, #tpu.memory_space<vmem>>, %arg2: memref<256x128xbf16, #tpu.memory_space<vmem>>, %arg3: memref<128x128xbf16, #tpu.memory_space<vmem>>) attributes {dimension_semantics = [#tpu.dimension_semantics<parallel>], iteration_bounds = array<i64: 1>, scalar_prefetch = 0 : i64, scratch_operands = 0 : i64, tpu.core_type = #tpu.core_type<tc>, window_params = [{transform_indices = @transform_0, window_bounds = array<i64: 128, 256>}, {pipeline_mode = #tpu.pipeline_mode<synchronous>, transform_indices = @transform_1, window_bounds = array<i64: 256, 128>}, {transform_indices = @transform_2, window_bounds = array<i64: 128, 128>}]} {
    %c0 = arith.constant 0 : index
    %c0_0 = arith.constant 0 : index
    %0 = vector.load %arg1[%c0, %c0_0] : memref<128x256xbf16, #tpu.memory_space<vmem>>, vector<128x256xbf16>
    %c0_1 = arith.constant 0 : index
    %c0_2 = arith.constant 0 : index
    %1 = vector.load %arg2[%c0_1, %c0_2] : memref<256x128xbf16, #tpu.memory_space<vmem>>, vector<256x128xbf16>
    %cst = arith.constant dense<0.000000e+00> : vector<128x128xf32>
    %2 = tpu.matmul %0, %1, %cst {dimension_numbers = #tpu.dot_dimension_numbers<[1], [0], [0], [1], [0, 0, 1, 1], [], []>} : vector<128x256xbf16>, vector<256x128xbf16>, vector<128x128xf32> -> vector<128x128xf32>
    %3 = arith.truncf %2 : vector<128x128xf32> to vector<128x128xbf16>
    %c0_3 = arith.constant 0 : index
    %c0_4 = arith.constant 0 : index
    %4 = vector.load %arg3[%c0_3, %c0_4] : memref<128x128xbf16, #tpu.memory_space<vmem>>, vector<128x128xbf16>
    tpu.vector_store %arg3[%c0_3, %c0_4], %3 {strides = array<i32>} : memref<128x128xbf16, #tpu.memory_space<vmem>>, vector<128x128xbf16>,
    return
  }
  func.func @transform_0(%arg0: i32) -> (i32, i32) {
    %c0_i32 = arith.constant 0 : i32
    %c0_i32_0 = arith.constant 0 : i32
    return %arg0, %c0_i32 : i32, i32
  }
  func.func @transform_1(%arg0: i32) -> (i32, i32) {
    %c0_i32 = arith.constant 0 : i32
    %c0_i32_0 = arith.constant 0 : i32
    %c0_i32_1 = arith.constant 0 : i32
    return %c0_i32, %c0_i32_0 : i32, i32
  }
  func.func @transform_2(%arg0: i32) -> (i32, i32) {
    %c0_i32 = arith.constant 0 : i32
    %c0_i32_0 = arith.constant 0 : i32
    return %arg0, %c0_i32 : i32, i32
  }
}

module attributes {stable_mosaic.version = 11 : i64} {
  func.func @_propagate_kernel(%arg0: i32, %arg1: i32, %arg2: memref<1xi32, #tpu.memory_space<smem>>, %arg3: memref<1xi32, #tpu.memory_space<smem>>, %arg4: memref<128x128xbf16, #tpu.memory_space<vmem>>, %arg5: memref<128x128xbf16, #tpu.memory_space<vmem>>, %arg6: memref<1x128xf32, #tpu.memory_space<vmem>>, %arg7: memref<128x128xbf16, #tpu.memory_space<vmem>>, %arg8: memref<128x128xf32, #tpu.memory_space<vmem>>) attributes {dimension_semantics = [#tpu.dimension_semantics<parallel>, #tpu.dimension_semantics<arbitrary>], iteration_bounds = array<i64: 1, 1>, scalar_prefetch = 2 : i64, scratch_operands = 1 : i64, tpu.core_type = #tpu.core_type<tc>, window_params = [{transform_indices = @transform_0, window_bounds = array<i64: 128, 128>}, {transform_indices = @transform_1, window_bounds = array<i64: 128, 128>}, {pipeline_mode = #tpu.pipeline_mode<synchronous>, transform_indices = @transform_2, window_bounds = array<i64: 1, 128>}, {transform_indices = @transform_3, window_bounds = array<i64: 128, 128>}]} {
    %c0_i32 = arith.constant 0 : i32
    %0 = arith.cmpi eq, %arg1, %c0_i32 : i32
    %1 = arith.extui %0 : i1 to i32
    %c0_i32_0 = arith.constant 0 : i32
    %2 = arith.cmpi ne, %1, %c0_i32_0 : i32
    scf.if %2 {
      %cst = arith.constant 0.000000e+00 : f32
      %11 = vector.broadcast %cst : f32 to vector<128x128xf32>
      %c0 = arith.constant 0 : index
      %c0_4 = arith.constant 0 : index
      %12 = vector.load %arg8[%c0, %c0_4] : memref<128x128xf32, #tpu.memory_space<vmem>>, vector<128x128xf32>
      tpu.vector_store %arg8[%c0, %c0_4], %11 {strides = array<i32>} : memref<128x128xf32, #tpu.memory_space<vmem>>, vector<128x128xf32>,
    } else {
    }
    %3 = arith.index_cast %arg0 : i32 to index
    %4 = memref.load %arg3[%3] : memref<1xi32, #tpu.memory_space<smem>>
    %5 = arith.cmpi slt, %arg1, %4 : i32
    %6 = arith.extui %5 : i1 to i32
    %c0_i32_1 = arith.constant 0 : i32
    %7 = arith.cmpi ne, %6, %c0_i32_1 : i32
    scf.if %7 {
      %c0 = arith.constant 0 : index
      %c0_4 = arith.constant 0 : index
      %11 = vector.load %arg8[%c0, %c0_4] : memref<128x128xf32, #tpu.memory_space<vmem>>, vector<128x128xf32>
      %c0_5 = arith.constant 0 : index
      %c0_6 = arith.constant 0 : index
      %12 = vector.load %arg4[%c0_5, %c0_6] : memref<128x128xbf16, #tpu.memory_space<vmem>>, vector<128x128xbf16>
      %c0_7 = arith.constant 0 : index
      %c0_8 = arith.constant 0 : index
      %13 = vector.load %arg5[%c0_7, %c0_8] : memref<128x128xbf16, #tpu.memory_space<vmem>>, vector<128x128xbf16>
      %cst = arith.constant dense<0.000000e+00> : vector<128x128xf32>
      %14 = tpu.matmul %12, %13, %cst {dimension_numbers = #tpu.dot_dimension_numbers<[1], [0], [0], [1], [0, 0, 1, 1], [], []>} : vector<128x128xbf16>, vector<128x128xbf16>, vector<128x128xf32> -> vector<128x128xf32>
      %15 = arith.addf %11, %14 : vector<128x128xf32>
      %c0_9 = arith.constant 0 : index
      %c0_10 = arith.constant 0 : index
      %16 = vector.load %arg8[%c0_9, %c0_10] : memref<128x128xf32, #tpu.memory_space<vmem>>, vector<128x128xf32>
      tpu.vector_store %arg8[%c0_9, %c0_10], %15 {strides = array<i32>} : memref<128x128xf32, #tpu.memory_space<vmem>>, vector<128x128xf32>,
    } else {
    }
    %c0_i32_2 = arith.constant 0 : i32
    %8 = arith.cmpi eq, %arg1, %c0_i32_2 : i32
    %9 = arith.extui %8 : i1 to i32
    %c0_i32_3 = arith.constant 0 : i32
    %10 = arith.cmpi ne, %9, %c0_i32_3 : i32
    scf.if %10 {
      %c0 = arith.constant 0 : index
      %c0_4 = arith.constant 0 : index
      %11 = vector.load %arg8[%c0, %c0_4] : memref<128x128xf32, #tpu.memory_space<vmem>>, vector<128x128xf32>
      %c0_5 = arith.constant 0 : index
      %c0_6 = arith.constant 0 : index
      %12 = vector.load %arg6[%c0_5, %c0_6] : memref<1x128xf32, #tpu.memory_space<vmem>>, vector<1x128xf32>
      %13 = vector.broadcast %12 : vector<1x128xf32> to vector<128x128xf32>
      %14 = arith.addf %11, %13 : vector<128x128xf32>
      %cst = arith.constant 0.000000e+00 : f32
      %15 = vector.broadcast %cst : f32 to vector<128x128xf32>
      %16 = arith.maximumf %14, %15 : vector<128x128xf32>
      %17 = arith.truncf %16 : vector<128x128xf32> to vector<128x128xbf16>
      %c0_7 = arith.constant 0 : index
      %c0_8 = arith.constant 0 : index
      %18 = vector.load %arg7[%c0_7, %c0_8] : memref<128x128xbf16, #tpu.memory_space<vmem>>, vector<128x128xbf16>
      tpu.vector_store %arg7[%c0_7, %c0_8], %17 {strides = array<i32>} : memref<128x128xbf16, #tpu.memory_space<vmem>>, vector<128x128xbf16>,
    } else {
    }
    return
  }
  func.func @transform_0(%arg0: i32, %arg1: i32, %arg2: memref<1xi32, #tpu.memory_space<smem>>, %arg3: memref<1xi32, #tpu.memory_space<smem>>) -> (i32, i32) {
    %c1_i32 = arith.constant 1 : i32
    %0 = arith.muli %arg0, %c1_i32 : i32
    %1 = arith.addi %0, %arg1 : i32
    %2 = arith.index_cast %1 : i32 to index
    %3 = memref.load %arg2[%2] : memref<1xi32, #tpu.memory_space<smem>>
    %c0_i32 = arith.constant 0 : i32
    return %arg0, %3 : i32, i32
  }
  func.func @transform_1(%arg0: i32, %arg1: i32, %arg2: memref<1xi32, #tpu.memory_space<smem>>, %arg3: memref<1xi32, #tpu.memory_space<smem>>) -> (i32, i32) {
    %c1_i32 = arith.constant 1 : i32
    %0 = arith.muli %arg0, %c1_i32 : i32
    %1 = arith.addi %0, %arg1 : i32
    %2 = arith.index_cast %1 : i32 to index
    %3 = memref.load %arg2[%2] : memref<1xi32, #tpu.memory_space<smem>>
    %c0_i32 = arith.constant 0 : i32
    %c0_i32_0 = arith.constant 0 : i32
    return %3, %c0_i32 : i32, i32
  }
  func.func @transform_2(%arg0: i32, %arg1: i32, %arg2: memref<1xi32, #tpu.memory_space<smem>>, %arg3: memref<1xi32, #tpu.memory_space<smem>>) -> (i32, i32) {
    %c0_i32 = arith.constant 0 : i32
    %c0_i32_0 = arith.constant 0 : i32
    %c0_i32_1 = arith.constant 0 : i32
    return %c0_i32, %c0_i32_0 : i32, i32
  }
  func.func @transform_3(%arg0: i32, %arg1: i32, %arg2: memref<1xi32, #tpu.memory_space<smem>>, %arg3: memref<1xi32, #tpu.memory_space<smem>>) -> (i32, i32) {
    %c0_i32 = arith.constant 0 : i32
    %c0_i32_0 = arith.constant 0 : i32
    return %arg0, %c0_i32 : i32, i32
  }
}

module attributes {stable_mosaic.version = 11 : i64} {
  func.func @_pool_kernel(%arg0: i32, %arg1: memref<8x128xf32, #tpu.memory_space<vmem>>, %arg2: memref<128x256xbf16, #tpu.memory_space<vmem>>, %arg3: memref<8x256xf32, #tpu.memory_space<vmem>>) attributes {dimension_semantics = [#tpu.dimension_semantics<arbitrary>], iteration_bounds = array<i64: 1>, scalar_prefetch = 0 : i64, scratch_operands = 0 : i64, tpu.core_type = #tpu.core_type<tc>, window_params = [{transform_indices = @transform_0, window_bounds = array<i64: 8, 128>}, {transform_indices = @transform_1, window_bounds = array<i64: 128, 256>}, {pipeline_mode = #tpu.pipeline_mode<synchronous>, transform_indices = @transform_2, window_bounds = array<i64: 8, 256>}]} {
    %c0_i32 = arith.constant 0 : i32
    %0 = arith.cmpi eq, %arg0, %c0_i32 : i32
    %1 = arith.extui %0 : i1 to i32
    %c0_i32_0 = arith.constant 0 : i32
    %2 = arith.cmpi ne, %1, %c0_i32_0 : i32
    scf.if %2 {
      %cst_8 = arith.constant 0.000000e+00 : f32
      %10 = vector.broadcast %cst_8 : f32 to vector<8x256xf32>
      %c0_9 = arith.constant 0 : index
      %c0_10 = arith.constant 0 : index
      %11 = vector.load %arg3[%c0_9, %c0_10] : memref<8x256xf32, #tpu.memory_space<vmem>>, vector<8x256xf32>
      tpu.vector_store %arg3[%c0_9, %c0_10], %10 {strides = array<i32>} : memref<8x256xf32, #tpu.memory_space<vmem>>, vector<8x256xf32>,
    } else {
    }
    %c0 = arith.constant 0 : index
    %c0_1 = arith.constant 0 : index
    %3 = vector.load %arg3[%c0, %c0_1] : memref<8x256xf32, #tpu.memory_space<vmem>>, vector<8x256xf32>
    %c0_2 = arith.constant 0 : index
    %c0_3 = arith.constant 0 : index
    %4 = vector.load %arg1[%c0_2, %c0_3] : memref<8x128xf32, #tpu.memory_space<vmem>>, vector<8x128xf32>
    %c0_4 = arith.constant 0 : index
    %c0_5 = arith.constant 0 : index
    %5 = vector.load %arg2[%c0_4, %c0_5] : memref<128x256xbf16, #tpu.memory_space<vmem>>, vector<128x256xbf16>
    %6 = arith.extf %5 : vector<128x256xbf16> to vector<128x256xf32>
    %cst = arith.constant dense<0.000000e+00> : vector<8x256xf32>
    %7 = tpu.matmul %4, %6, %cst {dimension_numbers = #tpu.dot_dimension_numbers<[1], [0], [0], [1], [0, 0, 1, 1], [], []>} : vector<8x128xf32>, vector<128x256xf32>, vector<8x256xf32> -> vector<8x256xf32>
    %8 = arith.addf %3, %7 : vector<8x256xf32>
    %c0_6 = arith.constant 0 : index
    %c0_7 = arith.constant 0 : index
    %9 = vector.load %arg3[%c0_6, %c0_7] : memref<8x256xf32, #tpu.memory_space<vmem>>, vector<8x256xf32>
    tpu.vector_store %arg3[%c0_6, %c0_7], %8 {strides = array<i32>} : memref<8x256xf32, #tpu.memory_space<vmem>>, vector<8x256xf32>,
    return
  }
  func.func @transform_0(%arg0: i32) -> (i32, i32) {
    %c0_i32 = arith.constant 0 : i32
    %c0_i32_0 = arith.constant 0 : i32
    return %c0_i32, %arg0 : i32, i32
  }
  func.func @transform_1(%arg0: i32) -> (i32, i32) {
    %c0_i32 = arith.constant 0 : i32
    %c0_i32_0 = arith.constant 0 : i32
    return %arg0, %c0_i32 : i32, i32
  }
  func.func @transform_2(%arg0: i32) -> (i32, i32) {
    %c0_i32 = arith.constant 0 : i32
    %c0_i32_0 = arith.constant 0 : i32
    %c0_i32_1 = arith.constant 0 : i32
    return %c0_i32, %c0_i32_0 : i32, i32
  }
}

</mosaic_0001>

<bundles_post_ra>
// kernel: _bu_rumor_gcn_core.5
= control target key start
LH: loop header
LB: loop body
LE: loop exit
PB: predicated region body
PF: predicated region fallthrough
CT: control target
= control target key end

     0   :  { %s462_s1 = inlined_call_operand.vmem [shape: bf16[128,128], index: 1, kind: input, shape index: {}]   ;;  %s463_s0 = inlined_call_operand.vmem [shape: bf16[128,128], index: 0, kind: input, shape index: {}]   ;;  %s464_s2 = inlined_call_operand.vmem [shape: bf16[128,128], index: 2, kind: output, shape index: {}]  }
   0x1   :  { %v303_v0 = vld [vmem:[%s462_s1 + $0x38] sm:$0xff]  ;;  %v302_v1 = vld [vmem:[%s462_s1 + $0x30] sm:$0xff]  ;;  %v301_v2 = vld [vmem:[%s462_s1 + $0x28] sm:$0xff] }
   0x2   :  { %139 = vmatpush.bf16.msra.mxu0 %v303_v0  ;;  %351 = vmatpush.bf16.msra.mxu1 %v303_v0  ;;  %v300_v3 = vld [vmem:[%s462_s1 + $0x20] sm:$0xff]  ;;  %v299_v4 = vld [vmem:[%s462_s1 + $0x18] sm:$0xff]  ;;  %v298_v5 = vld [vmem:[%s462_s1 + $0x10] sm:$0xff] }
   0x3   :  { %352 = vmatpush.bf16.msra.mxu2 %v303_v0  ;;  %353 = vmatpush.bf16.msra.mxu3 %v303_v0  ;;  %v297_v6 = vld [vmem:[%s462_s1 + $0x8] sm:$0xff]  ;;  %v296_v7 = vld [vmem:[%s462_s1] sm:$0xff]  ;;  %v290_v9 = vld [vmem:[%s463_s0 + $0x10] sm:$0xff] }
   0x4   :  { %v288_v8 = vld [vmem:[%s463_s0] sm:$0xff]  ;;  %v294_v11 = vld [vmem:[%s463_s0 + $0x30] sm:$0xff]  ;;  %v289_v12 = vld [vmem:[%s463_s0 + $0x8] sm:$0xff] }
   0x5   :  { %v292_v10 = vld [vmem:[%s463_s0 + $0x20] sm:$0xff]  ;;  %v291_v13 = vld [vmem:[%s463_s0 + $0x18] sm:$0xff]  ;;  %v293_v14 = vld [vmem:[%s463_s0 + $0x28] sm:$0xff] }
   0x6   :  { %140 = vmatpush.bf16.msra.mxu0 %v302_v1  ;;  %354 = vmatpush.bf16.msra.mxu1 %v302_v1  ;;  %v295_v15 = vld [vmem:[%s463_s0 + $0x38] sm:$0xff] }
   0x7   :  { %355 = vmatpush.bf16.msra.mxu2 %v302_v1  ;;  %356 = vmatpush.bf16.msra.mxu3 %v302_v1 }
   0xa   :  { %141 = vmatpush.bf16.msra.mxu0 %v301_v2  ;;  %357 = vmatpush.bf16.msra.mxu1 %v301_v2 }
   0xb   :  { %358 = vmatpush.bf16.msra.mxu2 %v301_v2  ;;  %359 = vmatpush.bf16.msra.mxu3 %v301_v2 }
   0xe   :  { %142 = vmatpush.bf16.msra.mxu0 %v300_v3  ;;  %360 = vmatpush.bf16.msra.mxu1 %v300_v3 }
   0xf   :  { %361 = vmatpush.bf16.msra.mxu2 %v300_v3  ;;  %362 = vmatpush.bf16.msra.mxu3 %v300_v3 }
  0x12   :  { %143 = vmatpush.bf16.msra.mxu0 %v299_v4  ;;  %363 = vmatpush.bf16.msra.mxu1 %v299_v4 }
  0x13   :  { %364 = vmatpush.bf16.msra.mxu2 %v299_v4  ;;  %365 = vmatpush.bf16.msra.mxu3 %v299_v4 }
  0x16   :  { %144 = vmatpush.bf16.msra.mxu0 %v298_v5  ;;  %366 = vmatpush.bf16.msra.mxu1 %v298_v5 }
  0x17   :  { %367 = vmatpush.bf16.msra.mxu2 %v298_v5  ;;  %368 = vmatpush.bf16.msra.mxu3 %v298_v5 }
  0x1a   :  { %145 = vmatpush.bf16.msra.mxu0 %v297_v6  ;;  %369 = vmatpush.bf16.msra.mxu1 %v297_v6 }
  0x1b   :  { %370 = vmatpush.bf16.msra.mxu2 %v297_v6  ;;  %371 = vmatpush.bf16.msra.mxu3 %v297_v6 }
  0x1e   :  { %146 = vmatpush.bf16.msra.mxu0 %v296_v7  ;;  %372 = vmatpush.bf16.msra.mxu1 %v296_v7 }
  0x1f   :  { %373 = vmatpush.bf16.msra.mxu2 %v296_v7  ;;  %374 = vmatpush.bf16.msra.mxu3 %v296_v7 }
  0x21   :  { %147 = vmatmul.bf16.vlgmr.msra.gmra.mxu0 %v288_v8  ;;  %157 = vmatmul.bf16.vlgmr.msra.gmra.mxu1 %v290_v9 }
  0x22   :  { %167 = vmatmul.bf16.vlgmr.msra.gmra.mxu2 %v292_v10  ;;  %177 = vmatmul.bf16.vlgmr.msra.gmra.mxu3 %v294_v11 }
  0x31   :  { %152 = vmatmul.bf16.gmra.mxu0 %v289_v12  ;;  %162 = vmatmul.bf16.gmra.mxu1 %v291_v13 }
  0x32   :  { %172 = vmatmul.bf16.gmra.mxu2 %v293_v14  ;;  %182 = vmatmul.bf16.gmra.mxu3 %v295_v15 }
  0x9e   :  { %v148_v16 = vpop.f32.mrf.mxu0  ;;  %v158_v17 = vpop.f32.mrf.mxu1 }
  0xa5   :  { %v168_v18 = vpop.f32.mrf.mxu2  ;;  %v178_v19 = vpop.f32.mrf.mxu3 }
  0xa6   :  { %v150_v20 = vpop.f32.mrf.mxu0  ;;  %v160_v21 = vpop.f32.mrf.mxu1 }
  0xa7   :  { %v307_v22 = vpack.c.bf16 %v150_v20, %v148_v16  ;;  %v317_v23 = vpack.c.bf16 %v160_v21, %v158_v17 }
  0xa9   :  { %308 = vst [vmem:[%s464_s2] sm:$0xff] %v307_v22  }
  0xaa   :  { %345 = vst [vmem:[%s464_s2 + $0x10] sm:$0xff] %v317_v23  }
  0xad   :  { %v170_v24 = vpop.f32.mrf.mxu2  ;;  %v180_v25 = vpop.f32.mrf.mxu3 }
  0xae   :  { %v327_v26 = vpack.c.bf16 %v170_v24, %v168_v18  ;;  %v337_v27 = vpack.c.bf16 %v180_v25, %v178_v19  ;;  %v153_v28 = vpop.f32.mrf.mxu0  ;;  %v163_v29 = vpop.f32.mrf.mxu1 }
  0xb0   :  { %347 = vst [vmem:[%s464_s2 + $0x20] sm:$0xff] %v327_v26  }
  0xb1   :  { %349 = vst [vmem:[%s464_s2 + $0x30] sm:$0xff] %v337_v27  }
  0xb5   :  { %v173_v30 = vpop.f32.mrf.mxu2  ;;  %v183_v31 = vpop.f32.mrf.mxu3 }
  0xb6   :  { %v155_v32 = vpop.f32.mrf.mxu0  ;;  %v165_v33 = vpop.f32.mrf.mxu1 }
  0xb7   :  { %v312_v34 = vpack.c.bf16 %v155_v32, %v153_v28  ;;  %v322_v35 = vpack.c.bf16 %v165_v33, %v163_v29 }
  0xb9   :  { %344 = vst [vmem:[%s464_s2 + $0x8] sm:$0xff] %v312_v34  }
  0xba   :  { %346 = vst [vmem:[%s464_s2 + $0x18] sm:$0xff] %v322_v35  }
  0xbd   :  { %v175_v36 = vpop.f32.mrf.mxu2  ;;  %v185_v37 = vpop.f32.mrf.mxu3 }
  0xbe   :  { %v332_v38 = vpack.c.bf16 %v175_v36, %v173_v30  ;;  %v342_v39 = vpack.c.bf16 %v185_v37, %v183_v31 }
  0xc0   :  { %348 = vst [vmem:[%s464_s2 + $0x28] sm:$0xff] %v332_v38  }
  0xc1   :  { %350 = vst [vmem:[%s464_s2 + $0x38] sm:$0xff] %v342_v39  }

// kernel: _bu_rumor_gcn_core.6
= control target key start
LH: loop header
LB: loop body
LE: loop exit
PB: predicated region body
PF: predicated region fallthrough
CT: control target
= control target key end

     0   :  { %v562_v0 = vmov 0.0   ;;  %s658_s0 = inlined_call_operand.<no memory space> [shape: s32[1], index: 0, kind: input, shape index: {}]   ;;  %s659_s1 = inlined_call_operand.<no memory space> [shape: s32[1], index: 1, kind: input, shape index: {}]   ;;  %s660_s4 = inlined_call_operand.vmem [shape: f32[1,128], index: 4, kind: input, shape index: {}]   ;;  %s661_s5 = inlined_call_operand.vmem [shape: bf16[128,128], index: 5, kind: output, shape index: {}]   ;;  %s662_s2 = inlined_call_operand.vmem [shape: bf16[128,128], index: 2, kind: input, shape index: {}]   ;;  %s663_s3 = inlined_call_operand.vmem [shape: bf16[128,128], index: 3, kind: input, shape index: {}]  }
   0x1   :  { %p51_p0 = scmp.lt.s32.totalorder %s658_s0, 0  ;;  %s405_s22 = sshll.u32 %s658_s0, 4  ;;  %71 = vst [vmem:[#allocation2 + $0x30] sm:$0xff] %v562_v0 }
   0x2   :  { %p60_p1 = scmp.lt.s32.totalorder %s405_s22, 15  ;;  %72 = vst [vmem:[#allocation2] sm:$0xff] %v562_v0  ;;  %p408_p2 = scmp.le.s32.totalorder %s659_s1, 0 }
   0x3   :  { %s665_s0 = smov (!%p51_p0, %s658_s0), 0  ;;  %73 = vst [vmem:[#allocation2 + $0x58] sm:$0xff] %v562_v0 }
   0x4   :  { %s667_s22 = smov (!%p60_p1, %s405_s22), 15  ;;  %74 = vst [vmem:[#allocation2 + $0x18] sm:$0xff] %v562_v0  ;;  %s404_s25 = sshll.u32 %s665_s0, 2 }
   0x5   :  { %75 = vst [vmem:[#allocation2 + $0x50] sm:$0xff] %v562_v0  ;;  %s605_s28 = scalar_lea.vmem %s662_s2, %s404_s25  ;;  %s406_s29 = sshll.u32 %s667_s22, 2 }
   0x6   :  { %76 = vst [vmem:[#allocation2 + $0x68] sm:$0xff] %v562_v0  ;;  %s610_s7 = scalar_lea.vmem %s663_s3, %s406_s29 }
   0x7   :  { %77 = vst [vmem:[#allocation2 + $0x8] sm:$0xff] %v562_v0 }
   0x8   :  { %78 = vst [vmem:[#allocation2 + $0x48] sm:$0xff] %v562_v0 }
   0x9   :  { %79 = vst [vmem:[#allocation2 + $0x40] sm:$0xff] %v562_v0 }
   0xa   :  { %80 = vst [vmem:[#allocation2 + $0x20] sm:$0xff] %v562_v0 }
   0xb   :  { %81 = vst [vmem:[#allocation2 + $0x10] sm:$0xff] %v562_v0 }
   0xc   :  { %82 = vst [vmem:[#allocation2 + $0x38] sm:$0xff] %v562_v0  ;;  %91 = sbr.rel (%p408_p2) target bundleno = 210 (0xd2), region = 21 }
   0xd   :  { %83 = vst [vmem:[#allocation2 + $0x60] sm:$0xff] %v562_v0 }
   0xe   :  { %84 = vst [vmem:[#allocation2 + $0x70] sm:$0xff] %v562_v0 }
   0xf   :  { %85 = vst [vmem:[#allocation2 + $0x78] sm:$0xff] %v562_v0 }
  0x10   :  { %86 = vst [vmem:[#allocation2 + $0x28] sm:$0xff] %v562_v0 }
  0x11   :  { %v488_v1 = vld [vmem:[%s610_s7 + $0x38] sm:$0xff]  ;;  %v487_v2 = vld [vmem:[%s610_s7 + $0x30] sm:$0xff]  ;;  %v486_v3 = vld [vmem:[%s610_s7 + $0x28] sm:$0xff] }
  0x12   :  { %236 = vmatpush.bf16.msra.mxu0 %v488_v1  ;;  %536 = vmatpush.bf16.msra.mxu1 %v488_v1  ;;  %v485_v4 = vld [vmem:[%s610_s7 + $0x20] sm:$0xff]  ;;  %v484_v5 = vld [vmem:[%s610_s7 + $0x18] sm:$0xff]  ;;  %v483_v6 = vld [vmem:[%s610_s7 + $0x10] sm:$0xff] }
  0x13   :  { %537 = vmatpush.bf16.msra.mxu2 %v488_v1  ;;  %538 = vmatpush.bf16.msra.mxu3 %v488_v1  ;;  %v482_v7 = vld [vmem:[%s610_s7 + $0x8] sm:$0xff]  ;;  %v481_v8 = vld [vmem:[%s610_s7] sm:$0xff]  ;;  %v475_v10 = vld [vmem:[%s605_s28 + $0x10] sm:$0xff] }
  0x14   :  { %v473_v9 = vld [vmem:[%s605_s28] sm:$0xff]  ;;  %v479_v12 = vld [vmem:[%s605_s28 + $0x30] sm:$0xff]  ;;  %v474_v13 = vld [vmem:[%s605_s28 + $0x8] sm:$0xff] }
  0x15   :  { %v477_v11 = vld [vmem:[%s605_s28 + $0x20] sm:$0xff]  ;;  %v476_v14 = vld [vmem:[%s605_s28 + $0x18] sm:$0xff]  ;;  %v478_v15 = vld [vmem:[%s605_s28 + $0x28] sm:$0xff] }
  0x16   :  { %237 = vmatpush.bf16.msra.mxu0 %v487_v2  ;;  %539 = vmatpush.bf16.msra.mxu1 %v487_v2  ;;  %v480_v16 = vld [vmem:[%s605_s28 + $0x38] sm:$0xff]  ;;  %v92_v17 = vld [vmem:[#allocation2 + $0x30] sm:$0xff]  ;;  %v100_v23 = vld [vmem:[#allocation2 + $0x40] sm:$0xff] }
  0x17   :  { %540 = vmatpush.bf16.msra.mxu2 %v487_v2  ;;  %541 = vmatpush.bf16.msra.mxu3 %v487_v2  ;;  %v96_v18 = vld [vmem:[#allocation2 + $0x50] sm:$0xff]  ;;  %v104_v24 = vld [vmem:[#allocation2 + $0x60] sm:$0xff]  ;;  %v97_v26 = vld [vmem:[#allocation2 + $0x68] sm:$0xff] }
  0x18   :  { %v93_v25 = vld [vmem:[#allocation2] sm:$0xff]  ;;  %v105_v36 = vld [vmem:[#allocation2 + $0x70] sm:$0xff]  ;;  %v94_v37 = vld [vmem:[#allocation2 + $0x58] sm:$0xff] }
  0x19   :  { %v101_v35 = vld [vmem:[#allocation2 + $0x20] sm:$0xff]  ;;  %v98_v38 = vld [vmem:[#allocation2 + $0x8] sm:$0xff]  ;;  %v102_v47 = vld [vmem:[#allocation2 + $0x10] sm:$0xff] }
  0x1a   :  { %238 = vmatpush.bf16.msra.mxu0 %v486_v3  ;;  %542 = vmatpush.bf16.msra.mxu1 %v486_v3  ;;  %v106_v48 = vld [vmem:[#allocation2 + $0x78] sm:$0xff]  ;;  %v99_v50 = vld [vmem:[#allocation2 + $0x48] sm:$0xff] }
  0x1b   :  { %543 = vmatpush.bf16.msra.mxu2 %v486_v3  ;;  %544 = vmatpush.bf16.msra.mxu3 %v486_v3  ;;  %v95_v49 = vld [vmem:[#allocation2 + $0x18] sm:$0xff]  ;;  %v107_v60 = vld [vmem:[#allocation2 + $0x28] sm:$0xff] }
  0x1c   :  { %v103_v59 = vld [vmem:[#allocation2 + $0x38] sm:$0xff] }
  0x1e   :  { %239 = vmatpush.bf16.msra.mxu0 %v485_v4  ;;  %545 = vmatpush.bf16.msra.mxu1 %v485_v4 }
  0x1f   :  { %546 = vmatpush.bf16.msra.mxu2 %v485_v4  ;;  %547 = vmatpush.bf16.msra.mxu3 %v485_v4 }
  0x22   :  { %240 = vmatpush.bf16.msra.mxu0 %v484_v5  ;;  %548 = vmatpush.bf16.msra.mxu1 %v484_v5 }
  0x23   :  { %549 = vmatpush.bf16.msra.mxu2 %v484_v5  ;;  %550 = vmatpush.bf16.msra.mxu3 %v484_v5 }
  0x26   :  { %241 = vmatpush.bf16.msra.mxu0 %v483_v6  ;;  %551 = vmatpush.bf16.msra.mxu1 %v483_v6 }
  0x27   :  { %552 = vmatpush.bf16.msra.mxu2 %v483_v6  ;;  %553 = vmatpush.bf16.msra.mxu3 %v483_v6 }
  0x2a   :  { %242 = vmatpush.bf16.msra.mxu0 %v482_v7  ;;  %554 = vmatpush.bf16.msra.mxu1 %v482_v7 }
  0x2b   :  { %555 = vmatpush.bf16.msra.mxu2 %v482_v7  ;;  %556 = vmatpush.bf16.msra.mxu3 %v482_v7 }
  0x2e   :  { %243 = vmatpush.bf16.msra.mxu0 %v481_v8  ;;  %557 = vmatpush.bf16.msra.mxu1 %v481_v8 }
  0x2f   :  { %558 = vmatpush.bf16.msra.mxu2 %v481_v8  ;;  %559 = vmatpush.bf16.msra.mxu3 %v481_v8 }
  0x31   :  { %244 = vmatmul.bf16.vlgmr.msra.gmra.mxu0 %v473_v9  ;;  %254 = vmatmul.bf16.vlgmr.msra.gmra.mxu1 %v475_v10 }
  0x32   :  { %264 = vmatmul.bf16.vlgmr.msra.gmra.mxu2 %v477_v11  ;;  %274 = vmatmul.bf16.vlgmr.msra.gmra.mxu3 %v479_v12 }
  0x41   :  { %249 = vmatmul.bf16.gmra.mxu0 %v474_v13  ;;  %259 = vmatmul.bf16.gmra.mxu1 %v476_v14 }
  0x42   :  { %269 = vmatmul.bf16.gmra.mxu2 %v478_v15  ;;  %279 = vmatmul.bf16.gmra.mxu3 %v480_v16 }
  0xae   :  { %v245_v19 = vpop.f32.mrf.mxu0  ;;  %v255_v20 = vpop.f32.mrf.mxu1 }
  0xaf   :  { %v285_v21 = vadd.f32 %v245_v19, %v92_v17  ;;  %v289_v22 = vadd.f32 %v255_v20, %v96_v18 }
  0xb1   :  { %301 = vst [vmem:[#allocation2 + $0x30] sm:$0xff] %v285_v21 }
  0xb2   :  { %305 = vst [vmem:[#allocation2 + $0x50] sm:$0xff] %v289_v22 }
  0xb5   :  { %v265_v27 = vpop.f32.mrf.mxu2  ;;  %v275_v28 = vpop.f32.mrf.mxu3 }
  0xb6   :  { %v293_v29 = vadd.f32 %v265_v27, %v100_v23  ;;  %v297_v30 = vadd.f32 %v275_v28, %v104_v24  ;;  %v247_v31 = vpop.f32.mrf.mxu0  ;;  %v257_v32 = vpop.f32.mrf.mxu1 }
  0xb7   :  { %v286_v33 = vadd.f32 %v247_v31, %v93_v25  ;;  %v290_v34 = vadd.f32 %v257_v32, %v97_v26 }
  0xb8   :  { %309 = vst [vmem:[#allocation2 + $0x40] sm:$0xff] %v293_v29 }
  0xb9   :  { %313 = vst [vmem:[#allocation2 + $0x60] sm:$0xff] %v297_v30 }
  0xba   :  { %302 = vst [vmem:[#allocation2] sm:$0xff] %v286_v33 }
  0xbb   :  { %306 = vst [vmem:[#allocation2 + $0x68] sm:$0xff] %v290_v34 }
  0xbd   :  { %v267_v39 = vpop.f32.mrf.mxu2  ;;  %v277_v40 = vpop.f32.mrf.mxu3 }
  0xbe   :  { %v294_v41 = vadd.f32 %v267_v39, %v101_v35  ;;  %v298_v42 = vadd.f32 %v277_v40, %v105_v36  ;;  %v250_v43 = vpop.f32.mrf.mxu0  ;;  %v260_v44 = vpop.f32.mrf.mxu1 }
  0xbf   :  { %v287_v45 = vadd.f32 %v250_v43, %v94_v37  ;;  %v291_v46 = vadd.f32 %v260_v44, %v98_v38 }
  0xc0   :  { %310 = vst [vmem:[#allocation2 + $0x20] sm:$0xff] %v294_v41 }
  0xc1   :  { %314 = vst [vmem:[#allocation2 + $0x70] sm:$0xff] %v298_v42 }
  0xc2   :  { %303 = vst [vmem:[#allocation2 + $0x58] sm:$0xff] %v287_v45 }
  0xc3   :  { %307 = vst [vmem:[#allocation2 + $0x8] sm:$0xff] %v291_v46 }
  0xc5   :  { %v270_v51 = vpop.f32.mrf.mxu2  ;;  %v280_v52 = vpop.f32.mrf.mxu3 }
  0xc6   :  { %v295_v53 = vadd.f32 %v270_v51, %v102_v47  ;;  %v299_v54 = vadd.f32 %v280_v52, %v106_v48  ;;  %v252_v55 = vpop.f32.mrf.mxu0  ;;  %v262_v56 = vpop.f32.mrf.mxu1 }
  0xc7   :  { %v288_v57 = vadd.f32 %v252_v55, %v95_v49  ;;  %v292_v58 = vadd.f32 %v262_v56, %v99_v50 }
  0xc8   :  { %311 = vst [vmem:[#allocation2 + $0x10] sm:$0xff] %v295_v53 }
  0xc9   :  { %315 = vst [vmem:[#allocation2 + $0x78] sm:$0xff] %v299_v54 }
  0xca   :  { %304 = vst [vmem:[#allocation2 + $0x18] sm:$0xff] %v288_v57 }
  0xcb   :  { %308 = vst [vmem:[#allocation2 + $0x48] sm:$0xff] %v292_v58 }
  0xcd   :  { %v272_v61 = vpop.f32.mrf.mxu2  ;;  %v282_v62 = vpop.f32.mrf.mxu3 }
  0xce   :  { %v296_v63 = vadd.f32 %v272_v61, %v103_v59  ;;  %v300_v0 = vadd.f32 %v282_v62, %v107_v60 }
  0xd0   :  { %312 = vst [vmem:[#allocation2 + $0x38] sm:$0xff] %v296_v63 }
  0xd1   :  { %316 = vst [vmem:[#allocation2 + $0x28] sm:$0xff] %v300_v0 }
  0xd2 PF:  { %v320_v1 = vld [vmem:[#allocation2 + $0x30] sm:$0xff]  ;;  %v321_v2 = vld [vmem:[#allocation2] sm:$0xff]  ;;  %v322_v4 = vld [vmem:[#allocation2 + $0x58] sm:$0xff] }
  0xd3   :  { %v561_v3 = vld [vmem:[%s660_s4] ss:$0 sm:$0xff]  ;;  %v323_v5 = vld [vmem:[#allocation2 + $0x18] sm:$0xff]  ;;  %v324_v6 = vld [vmem:[#allocation2 + $0x50] sm:$0xff] }
  0xd4   :  { %v325_v7 = vld [vmem:[#allocation2 + $0x68] sm:$0xff]  ;;  %v340_v9 = vadd.f32 %v561_v3, %v320_v1  ;;  %v341_v10 = vadd.f32 %v561_v3, %v321_v2  ;;  %v342_v11 = vadd.f32 %v561_v3, %v322_v4  ;;  %v343_v12 = vadd.f32 %v561_v3, %v323_v5  ;;  %v328_v14 = vld [vmem:[#allocation2 + $0x40] sm:$0xff]  ;;  %v330_v20 = vld [vmem:[#allocation2 + $0x10] sm:$0xff] }
  0xd5   :  { %v326_v8 = vld [vmem:[#allocation2 + $0x8] sm:$0xff]  ;;  %v329_v15 = vld [vmem:[#allocation2 + $0x20] sm:$0xff]  ;;  %v344_v16 = vadd.f32 %v561_v3, %v324_v6  ;;  %v345_v17 = vadd.f32 %v561_v3, %v325_v7  ;;  %v348_v25 = vadd.f32 %v561_v3, %v328_v14  ;;  %v350_v32 = vadd.f32 %v561_v3, %v330_v20 }
  0xd6   :  { %v327_v13 = vld [vmem:[#allocation2 + $0x48] sm:$0xff]  ;;  %v346_v18 = vadd.f32 %v561_v3, %v326_v8  ;;  %v332_v22 = vld [vmem:[#allocation2 + $0x60] sm:$0xff]  ;;  %v492_v23 = vpack.c.bf16 %v341_v10, %v340_v9  ;;  %v497_v24 = vpack.c.bf16 %v343_v12, %v342_v11  ;;  %v349_v26 = vadd.f32 %v561_v3, %v329_v15  ;;  %v333_v27 = vld [vmem:[#allocation2 + $0x70] sm:$0xff] }
  0xd7   :  { %v347_v19 = vadd.f32 %v561_v3, %v327_v13  ;;  %v331_v21 = vld [vmem:[#allocation2 + $0x38] sm:$0xff]  ;;  %v502_v30 = vpack.c.bf16 %v345_v17, %v344_v16  ;;  %v352_v35 = vadd.f32 %v561_v3, %v332_v22  ;;  %v353_v36 = vadd.f32 %v561_v3, %v333_v27 }
  0xd8   :  { %v334_v28 = vld [vmem:[#allocation2 + $0x78] sm:$0xff]  ;;  %v335_v29 = vld [vmem:[#allocation2 + $0x28] sm:$0xff]  ;;  %v351_v33 = vadd.f32 %v561_v3, %v331_v21  ;;  %493 = vst [vmem:[%s661_s5] sm:$0xff] %v492_v23   ;;  %v512_v34 = vpack.c.bf16 %v349_v26, %v348_v25 }
  0xd9   :  { %v507_v31 = vpack.c.bf16 %v347_v19, %v346_v18  ;;  %v354_v37 = vadd.f32 %v561_v3, %v334_v28  ;;  %529 = vst [vmem:[%s661_s5 + $0x8] sm:$0xff] %v497_v24   ;;  %v355_v39 = vadd.f32 %v561_v3, %v335_v29  ;;  %v522_v40 = vpack.c.bf16 %v353_v36, %v352_v35 }
  0xda   :  { %v517_v38 = vpack.c.bf16 %v351_v33, %v350_v32  ;;  %530 = vst [vmem:[%s661_s5 + $0x10] sm:$0xff] %v502_v30  }
  0xdb   :  { %531 = vst [vmem:[%s661_s5 + $0x18] sm:$0xff] %v507_v31   ;;  %v527_v41 = vpack.c.bf16 %v355_v39, %v354_v37 }
  0xdc   :  { %532 = vst [vmem:[%s661_s5 + $0x20] sm:$0xff] %v512_v34  }
  0xdd   :  { %533 = vst [vmem:[%s661_s5 + $0x28] sm:$0xff] %v517_v38  }
  0xde   :  { %534 = vst [vmem:[%s661_s5 + $0x30] sm:$0xff] %v522_v40  }
  0xdf   :  { %535 = vst [vmem:[%s661_s5 + $0x38] sm:$0xff] %v527_v41  }

// kernel: _bu_rumor_gcn_core.7
= control target key start
LH: loop header
LB: loop body
LE: loop exit
PB: predicated region body
PF: predicated region fallthrough
CT: control target
= control target key end

     0   :  { %s775_s1 = inlined_call_operand.vmem [shape: bf16[256,128], index: 1, kind: input, shape index: {}]   ;;  %s776_s0 = inlined_call_operand.vmem [shape: bf16[128,256], index: 0, kind: input, shape index: {}]   ;;  %s777_s2 = inlined_call_operand.vmem [shape: bf16[128,128], index: 2, kind: output, shape index: {}]  }
   0x1   :  { %v520_v0 = vld [vmem:[%s775_s1 + $0x38] sm:$0xff]  ;;  %v519_v2 = vld [vmem:[%s775_s1 + $0x30] sm:$0xff]  ;;  %v518_v4 = vld [vmem:[%s775_s1 + $0x28] sm:$0xff] }
   0x2   :  { %v528_v1 = vld [vmem:[%s775_s1 + $0x78] sm:$0xff]  ;;  %235 = vmatpush.bf16.msra.mxu0 %v520_v0  ;;  %576 = vmatpush.bf16.msra.mxu2 %v520_v0  ;;  %v527_v3 = vld [vmem:[%s775_s1 + $0x70] sm:$0xff]  ;;  %v526_v5 = vld [vmem:[%s775_s1 + $0x68] sm:$0xff] }
   0x3   :  { %284 = vmatpush.bf16.msra.mxu1 %v528_v1  ;;  %584 = vmatpush.bf16.msra.mxu3 %v528_v1  ;;  %v517_v6 = vld [vmem:[%s775_s1 + $0x20] sm:$0xff]  ;;  %v516_v8 = vld [vmem:[%s775_s1 + $0x18] sm:$0xff]  ;;  %v515_v10 = vld [vmem:[%s775_s1 + $0x10] sm:$0xff] }
   0x4   :  { %v525_v7 = vld [vmem:[%s775_s1 + $0x60] sm:$0xff]  ;;  %v524_v9 = vld [vmem:[%s775_s1 + $0x58] sm:$0xff]  ;;  %v523_v11 = vld [vmem:[%s775_s1 + $0x50] sm:$0xff] }
   0x5   :  { %v514_v12 = vld [vmem:[%s775_s1 + $0x8] sm:$0xff]  ;;  %v513_v14 = vld [vmem:[%s775_s1] sm:$0xff]  ;;  %v379_v28 = vld [vmem:[%s776_s0 + $0x10] sm:$0xf] }
   0x6   :  { %236 = vmatpush.bf16.msra.mxu0 %v519_v2  ;;  %577 = vmatpush.bf16.msra.mxu2 %v519_v2  ;;  %v522_v13 = vld [vmem:[%s775_s1 + $0x48] sm:$0xff]  ;;  %v521_v15 = vld [vmem:[%s775_s1 + $0x40] sm:$0xff]  ;;  %v500_v29 = vld [vmem:[%s776_s0 + $0x14] sm:$0xf0] }
   0x7   :  { %285 = vmatpush.bf16.msra.mxu1 %v527_v3  ;;  %585 = vmatpush.bf16.msra.mxu3 %v527_v3  ;;  %v371_v16 = vld [vmem:[%s776_s0] sm:$0xf]  ;;  %v498_v17 = vld [vmem:[%s776_s0 + $0x4] sm:$0xf0]  ;;  %v497_v20 = vld [vmem:[%s776_s0 + $0x4] sm:$0xf]  ;;  %v380_v36 = vor.u32 %v500_v29, %v379_v28 }
   0x8   :  { %v403_v18 = vld [vmem:[%s776_s0 + $0x40] sm:$0xf]  ;;  %v506_v19 = vld [vmem:[%s776_s0 + $0x44] sm:$0xf0]  ;;  %v373_v21 = vld [vmem:[%s776_s0 + $0x8] sm:$0xf0]  ;;  %v372_v24 = vor.u32 %v498_v17, %v371_v16 }
   0x9   :  { %v505_v22 = vld [vmem:[%s776_s0 + $0x44] sm:$0xf]  ;;  %v405_v23 = vld [vmem:[%s776_s0 + $0x48] sm:$0xf0]  ;;  %v404_v25 = vor.u32 %v506_v19, %v403_v18  ;;  %v376_v26 = vor.u32 %v497_v20, %v373_v21  ;;  %v411_v30 = vld [vmem:[%s776_s0 + $0x50] sm:$0xf] }
   0xa   :  { %237 = vmatpush.bf16.msra.mxu0 %v518_v4  ;;  %578 = vmatpush.bf16.msra.mxu2 %v518_v4  ;;  %v408_v27 = vor.u32 %v505_v22, %v405_v23  ;;  %v508_v31 = vld [vmem:[%s776_s0 + $0x54] sm:$0xf0]  ;;  %v499_v32 = vld [vmem:[%s776_s0 + $0x14] sm:$0xf]  ;;  %v381_v33 = vld [vmem:[%s776_s0 + $0x18] sm:$0xf0] }
   0xb   :  { %286 = vmatpush.bf16.msra.mxu1 %v526_v5  ;;  %586 = vmatpush.bf16.msra.mxu3 %v526_v5  ;;  %v507_v34 = vld [vmem:[%s776_s0 + $0x54] sm:$0xf]  ;;  %v413_v35 = vld [vmem:[%s776_s0 + $0x58] sm:$0xf0]  ;;  %v412_v37 = vor.u32 %v508_v31, %v411_v30  ;;  %v384_v38 = vor.u32 %v499_v32, %v381_v33  ;;  %v387_v40 = vld [vmem:[%s776_s0 + $0x20] sm:$0xf] }
   0xc   :  { %v416_v39 = vor.u32 %v507_v34, %v413_v35  ;;  %v502_v41 = vld [vmem:[%s776_s0 + $0x24] sm:$0xf0]  ;;  %v419_v42 = vld [vmem:[%s776_s0 + $0x60] sm:$0xf]  ;;  %v501_v44 = vld [vmem:[%s776_s0 + $0x24] sm:$0xf] }
   0xd   :  { %v510_v43 = vld [vmem:[%s776_s0 + $0x64] sm:$0xf0]  ;;  %v389_v45 = vld [vmem:[%s776_s0 + $0x28] sm:$0xf0]  ;;  %v509_v46 = vld [vmem:[%s776_s0 + $0x64] sm:$0xf]  ;;  %v388_v48 = vor.u32 %v502_v41, %v387_v40 }
   0xe   :  { %238 = vmatpush.bf16.msra.mxu0 %v517_v6  ;;  %579 = vmatpush.bf16.msra.mxu2 %v517_v6  ;;  %v421_v47 = vld [vmem:[%s776_s0 + $0x68] sm:$0xf0]  ;;  %v420_v49 = vor.u32 %v510_v43, %v419_v42  ;;  %v392_v50 = vor.u32 %v501_v44, %v389_v45  ;;  %v395_v52 = vld [vmem:[%s776_s0 + $0x30] sm:$0xf]  ;;  %v504_v53 = vld [vmem:[%s776_s0 + $0x34] sm:$0xf0] }
   0xf   :  { %287 = vmatpush.bf16.msra.mxu1 %v525_v7  ;;  %587 = vmatpush.bf16.msra.mxu3 %v525_v7  ;;  %v424_v51 = vor.u32 %v509_v46, %v421_v47  ;;  %v427_v54 = vld [vmem:[%s776_s0 + $0x70] sm:$0xf]  ;;  %v512_v55 = vld [vmem:[%s776_s0 + $0x74] sm:$0xf0]  ;;  %v503_v56 = vld [vmem:[%s776_s0 + $0x34] sm:$0xf]  ;;  %v396_v60 = vor.u32 %v504_v53, %v395_v52 }
  0x10   :  { %v397_v57 = vld [vmem:[%s776_s0 + $0x38] sm:$0xf0]  ;;  %v511_v58 = vld [vmem:[%s776_s0 + $0x74] sm:$0xf]  ;;  %v428_v61 = vor.u32 %v512_v55, %v427_v54 }
  0x11   :  { %v429_v59 = vld [vmem:[%s776_s0 + $0x78] sm:$0xf0]  ;;  %v400_v62 = vor.u32 %v503_v56, %v397_v57 }
  0x12   :  { %239 = vmatpush.bf16.msra.mxu0 %v516_v8  ;;  %580 = vmatpush.bf16.msra.mxu2 %v516_v8  ;;  %v432_v63 = vor.u32 %v511_v58, %v429_v59 }
  0x13   :  { %288 = vmatpush.bf16.msra.mxu1 %v524_v9  ;;  %588 = vmatpush.bf16.msra.mxu3 %v524_v9 }
  0x16   :  { %240 = vmatpush.bf16.msra.mxu0 %v515_v10  ;;  %581 = vmatpush.bf16.msra.mxu2 %v515_v10 }
  0x17   :  { %289 = vmatpush.bf16.msra.mxu1 %v523_v11  ;;  %589 = vmatpush.bf16.msra.mxu3 %v523_v11 }
  0x1a   :  { %241 = vmatpush.bf16.msra.mxu0 %v514_v12  ;;  %582 = vmatpush.bf16.msra.mxu2 %v514_v12 }
  0x1b   :  { %290 = vmatpush.bf16.msra.mxu1 %v522_v13  ;;  %590 = vmatpush.bf16.msra.mxu3 %v522_v13 }
  0x1e   :  { %242 = vmatpush.bf16.msra.mxu0 %v513_v14  ;;  %583 = vmatpush.bf16.msra.mxu2 %v513_v14 }
  0x1f   :  { %291 = vmatpush.bf16.msra.mxu1 %v521_v15  ;;  %591 = vmatpush.bf16.msra.mxu3 %v521_v15 }
  0x21   :  { %243 = vmatmul.bf16.vlgmr.msra.gmra.mxu0 %v372_v24  ;;  %263 = vmatmul.bf16.vlgmr.msra.gmra.mxu2 %v404_v25 }
  0x22   :  { %292 = vmatmul.bf16.vlgmr.msra.gmra.mxu1 %v376_v26  ;;  %312 = vmatmul.bf16.vlgmr.msra.gmra.mxu3 %v408_v27 }
  0x31   :  { %248 = vmatmul.bf16.gmra.mxu0 %v380_v36  ;;  %268 = vmatmul.bf16.gmra.mxu2 %v412_v37 }
  0x32   :  { %297 = vmatmul.bf16.gmra.mxu1 %v384_v38  ;;  %317 = vmatmul.bf16.gmra.mxu3 %v416_v39 }
  0x41   :  { %253 = vmatmul.bf16.gmra.mxu0 %v388_v48  ;;  %273 = vmatmul.bf16.gmra.mxu2 %v420_v49 }
  0x42   :  { %302 = vmatmul.bf16.gmra.mxu1 %v392_v50  ;;  %322 = vmatmul.bf16.gmra.mxu3 %v424_v51 }
  0x51   :  { %258 = vmatmul.bf16.gmra.mxu0 %v396_v60  ;;  %278 = vmatmul.bf16.gmra.mxu2 %v428_v61 }
  0x52   :  { %307 = vmatmul.bf16.gmra.mxu1 %v400_v62  ;;  %327 = vmatmul.bf16.gmra.mxu3 %v432_v63 }
  0x9e   :  { %v244_v0 = vpop.f32.mrf.mxu0 }
  0x9f   :  { %v293_v1 = vpop.f32.mrf.mxu1 }
  0xa0   :  { %v294_v6 = vadd.f32 %v293_v1, %v244_v0 }
  0xa4   :  { %v264_v2 = vpop.f32.mrf.mxu2 }
  0xa5   :  { %v313_v3 = vpop.f32.mrf.mxu3 }
  0xa6   :  { %v246_v4 = vpop.f32.mrf.mxu0  ;;  %v314_v11 = vadd.f32 %v313_v3, %v264_v2 }
  0xa7   :  { %v295_v5 = vpop.f32.mrf.mxu1 }
  0xa8   :  { %v296_v7 = vadd.f32 %v295_v5, %v246_v4 }
  0xaa   :  { %v532_v8 = vpack.c.bf16 %v296_v7, %v294_v6 }
  0xac   :  { %533 = vst [vmem:[%s777_s2] sm:$0xff] %v532_v8   ;;  %v266_v9 = vpop.f32.mrf.mxu2 }
  0xad   :  { %v315_v10 = vpop.f32.mrf.mxu3 }
  0xae   :  { %v316_v12 = vadd.f32 %v315_v10, %v266_v9  ;;  %v249_v13 = vpop.f32.mrf.mxu0 }
  0xaf   :  { %v298_v14 = vpop.f32.mrf.mxu1 }
  0xb0   :  { %v552_v15 = vpack.c.bf16 %v316_v12, %v314_v11  ;;  %v299_v20 = vadd.f32 %v298_v14, %v249_v13 }
  0xb2   :  { %572 = vst [vmem:[%s777_s2 + $0x20] sm:$0xff] %v552_v15  }
  0xb4   :  { %v269_v16 = vpop.f32.mrf.mxu2 }
  0xb5   :  { %v318_v17 = vpop.f32.mrf.mxu3 }
  0xb6   :  { %v251_v18 = vpop.f32.mrf.mxu0  ;;  %v319_v25 = vadd.f32 %v318_v17, %v269_v16 }
  0xb7   :  { %v300_v19 = vpop.f32.mrf.mxu1 }
  0xb8   :  { %v301_v21 = vadd.f32 %v300_v19, %v251_v18 }
  0xba   :  { %v537_v22 = vpack.c.bf16 %v301_v21, %v299_v20 }
  0xbc   :  { %569 = vst [vmem:[%s777_s2 + $0x8] sm:$0xff] %v537_v22   ;;  %v271_v23 = vpop.f32.mrf.mxu2 }
  0xbd   :  { %v320_v24 = vpop.f32.mrf.mxu3 }
  0xbe   :  { %v321_v26 = vadd.f32 %v320_v24, %v271_v23  ;;  %v254_v27 = vpop.f32.mrf.mxu0 }
  0xbf   :  { %v303_v28 = vpop.f32.mrf.mxu1 }
  0xc0   :  { %v557_v29 = vpack.c.bf16 %v321_v26, %v319_v25  ;;  %v304_v34 = vadd.f32 %v303_v28, %v254_v27 }
  0xc2   :  { %573 = vst [vmem:[%s777_s2 + $0x28] sm:$0xff] %v557_v29  }
  0xc4   :  { %v274_v30 = vpop.f32.mrf.mxu2 }
  0xc5   :  { %v323_v31 = vpop.f32.mrf.mxu3 }
  0xc6   :  { %v256_v32 = vpop.f32.mrf.mxu0  ;;  %v324_v39 = vadd.f32 %v323_v31, %v274_v30 }
  0xc7   :  { %v305_v33 = vpop.f32.mrf.mxu1 }
  0xc8   :  { %v306_v35 = vadd.f32 %v305_v33, %v256_v32 }
  0xca   :  { %v542_v36 = vpack.c.bf16 %v306_v35, %v304_v34 }
  0xcc   :  { %570 = vst [vmem:[%s777_s2 + $0x10] sm:$0xff] %v542_v36   ;;  %v276_v37 = vpop.f32.mrf.mxu2 }
  0xcd   :  { %v325_v38 = vpop.f32.mrf.mxu3 }
  0xce   :  { %v326_v40 = vadd.f32 %v325_v38, %v276_v37  ;;  %v259_v41 = vpop.f32.mrf.mxu0 }
  0xcf   :  { %v308_v42 = vpop.f32.mrf.mxu1 }
  0xd0   :  { %v562_v43 = vpack.c.bf16 %v326_v40, %v324_v39  ;;  %v309_v48 = vadd.f32 %v308_v42, %v259_v41 }
  0xd2   :  { %574 = vst [vmem:[%s777_s2 + $0x30] sm:$0xff] %v562_v43  }
  0xd4   :  { %v279_v44 = vpop.f32.mrf.mxu2 }
  0xd5   :  { %v328_v45 = vpop.f32.mrf.mxu3 }
  0xd6   :  { %v261_v46 = vpop.f32.mrf.mxu0  ;;  %v329_v53 = vadd.f32 %v328_v45, %v279_v44 }
  0xd7   :  { %v310_v47 = vpop.f32.mrf.mxu1 }
  0xd8   :  { %v311_v49 = vadd.f32 %v310_v47, %v261_v46 }
  0xda   :  { %v547_v50 = vpack.c.bf16 %v311_v49, %v309_v48 }
  0xdc   :  { %571 = vst [vmem:[%s777_s2 + $0x18] sm:$0xff] %v547_v50   ;;  %v281_v51 = vpop.f32.mrf.mxu2 }
  0xdd   :  { %v330_v52 = vpop.f32.mrf.mxu3 }
  0xde   :  { %v331_v54 = vadd.f32 %v330_v52, %v281_v51 }
  0xe0   :  { %v567_v55 = vpack.c.bf16 %v331_v54, %v329_v53 }
  0xe2   :  { %575 = vst [vmem:[%s777_s2 + $0x38] sm:$0xff] %v567_v55  }

// kernel: _bu_rumor_gcn_core.8
= control target key start
LH: loop header
LB: loop body
LE: loop exit
PB: predicated region body
PF: predicated region fallthrough
CT: control target
= control target key end

     0   :  { %v578_v0 = vmov 0.0   ;;  %s674_s0 = inlined_call_operand.<no memory space> [shape: s32[1], index: 0, kind: input, shape index: {}]   ;;  %s675_s1 = inlined_call_operand.<no memory space> [shape: s32[1], index: 1, kind: input, shape index: {}]   ;;  %s676_s4 = inlined_call_operand.vmem [shape: f32[1,128], index: 4, kind: input, shape index: {}]   ;;  %s677_s5 = inlined_call_operand.vmem [shape: bf16[128,128], index: 5, kind: output, shape index: {}]   ;;  %s678_s2 = inlined_call_operand.vmem [shape: bf16[128,128], index: 2, kind: input, shape index: {}]   ;;  %s679_s3 = inlined_call_operand.vmem [shape: bf16[128,128], index: 3, kind: input, shape index: {}]  }
   0x1   :  { %p51_p0 = scmp.lt.s32.totalorder %s674_s0, 0  ;;  %s421_s22 = sshll.u32 %s674_s0, 4  ;;  %71 = vst [vmem:[#allocation2 + $0x30] sm:$0xff] %v578_v0 }
   0x2   :  { %p60_p1 = scmp.lt.s32.totalorder %s421_s22, 15  ;;  %72 = vst [vmem:[#allocation2] sm:$0xff] %v578_v0  ;;  %p424_p2 = scmp.le.s32.totalorder %s675_s1, 0 }
   0x3   :  { %s681_s0 = smov (!%p51_p0, %s674_s0), 0  ;;  %73 = vst [vmem:[#allocation2 + $0x58] sm:$0xff] %v578_v0 }
   0x4   :  { %s683_s22 = smov (!%p60_p1, %s421_s22), 15  ;;  %74 = vst [vmem:[#allocation2 + $0x18] sm:$0xff] %v578_v0  ;;  %s420_s25 = sshll.u32 %s681_s0, 2 }
   0x5   :  { %75 = vst [vmem:[#allocation2 + $0x50] sm:$0xff] %v578_v0  ;;  %s621_s28 = scalar_lea.vmem %s678_s2, %s420_s25  ;;  %s422_s29 = sshll.u32 %s683_s22, 2 }
   0x6   :  { %76 = vst [vmem:[#allocation2 + $0x68] sm:$0xff] %v578_v0  ;;  %s626_s7 = scalar_lea.vmem %s679_s3, %s422_s29 }
   0x7   :  { %77 = vst [vmem:[#allocation2 + $0x8] sm:$0xff] %v578_v0 }
   0x8   :  { %78 = vst [vmem:[#allocation2 + $0x48] sm:$0xff] %v578_v0 }
   0x9   :  { %79 = vst [vmem:[#allocation2 + $0x40] sm:$0xff] %v578_v0 }
   0xa   :  { %80 = vst [vmem:[#allocation2 + $0x20] sm:$0xff] %v578_v0 }
   0xb   :  { %81 = vst [vmem:[#allocation2 + $0x10] sm:$0xff] %v578_v0 }
   0xc   :  { %82 = vst [vmem:[#allocation2 + $0x38] sm:$0xff] %v578_v0  ;;  %91 = sbr.rel (%p424_p2) target bundleno = 210 (0xd2), region = 21 }
   0xd   :  { %83 = vst [vmem:[#allocation2 + $0x60] sm:$0xff] %v578_v0 }
   0xe   :  { %84 = vst [vmem:[#allocation2 + $0x70] sm:$0xff] %v578_v0 }
   0xf   :  { %85 = vst [vmem:[#allocation2 + $0x78] sm:$0xff] %v578_v0 }
  0x10   :  { %86 = vst [vmem:[#allocation2 + $0x28] sm:$0xff] %v578_v0 }
  0x11   :  { %v504_v1 = vld [vmem:[%s626_s7 + $0x38] sm:$0xff]  ;;  %v503_v2 = vld [vmem:[%s626_s7 + $0x30] sm:$0xff]  ;;  %v502_v3 = vld [vmem:[%s626_s7 + $0x28] sm:$0xff] }
  0x12   :  { %236 = vmatpush.bf16.msra.mxu0 %v504_v1  ;;  %552 = vmatpush.bf16.msra.mxu1 %v504_v1  ;;  %v501_v4 = vld [vmem:[%s626_s7 + $0x20] sm:$0xff]  ;;  %v500_v5 = vld [vmem:[%s626_s7 + $0x18] sm:$0xff]  ;;  %v499_v6 = vld [vmem:[%s626_s7 + $0x10] sm:$0xff] }
  0x13   :  { %553 = vmatpush.bf16.msra.mxu2 %v504_v1  ;;  %554 = vmatpush.bf16.msra.mxu3 %v504_v1  ;;  %v498_v7 = vld [vmem:[%s626_s7 + $0x8] sm:$0xff]  ;;  %v497_v8 = vld [vmem:[%s626_s7] sm:$0xff]  ;;  %v491_v10 = vld [vmem:[%s621_s28 + $0x10] sm:$0xff] }
  0x14   :  { %v489_v9 = vld [vmem:[%s621_s28] sm:$0xff]  ;;  %v495_v12 = vld [vmem:[%s621_s28 + $0x30] sm:$0xff]  ;;  %v490_v13 = vld [vmem:[%s621_s28 + $0x8] sm:$0xff] }
  0x15   :  { %v493_v11 = vld [vmem:[%s621_s28 + $0x20] sm:$0xff]  ;;  %v492_v14 = vld [vmem:[%s621_s28 + $0x18] sm:$0xff]  ;;  %v494_v15 = vld [vmem:[%s621_s28 + $0x28] sm:$0xff] }
  0x16   :  { %237 = vmatpush.bf16.msra.mxu0 %v503_v2  ;;  %555 = vmatpush.bf16.msra.mxu1 %v503_v2  ;;  %v496_v16 = vld [vmem:[%s621_s28 + $0x38] sm:$0xff]  ;;  %v92_v17 = vld [vmem:[#allocation2 + $0x30] sm:$0xff]  ;;  %v100_v23 = vld [vmem:[#allocation2 + $0x40] sm:$0xff] }
  0x17   :  { %556 = vmatpush.bf16.msra.mxu2 %v503_v2  ;;  %557 = vmatpush.bf16.msra.mxu3 %v503_v2  ;;  %v96_v18 = vld [vmem:[#allocation2 + $0x50] sm:$0xff]  ;;  %v104_v24 = vld [vmem:[#allocation2 + $0x60] sm:$0xff]  ;;  %v97_v26 = vld [vmem:[#allocation2 + $0x68] sm:$0xff] }
  0x18   :  { %v93_v25 = vld [vmem:[#allocation2] sm:$0xff]  ;;  %v105_v36 = vld [vmem:[#allocation2 + $0x70] sm:$0xff]  ;;  %v94_v37 = vld [vmem:[#allocation2 + $0x58] sm:$0xff] }
  0x19   :  { %v101_v35 = vld [vmem:[#allocation2 + $0x20] sm:$0xff]  ;;  %v98_v38 = vld [vmem:[#allocation2 + $0x8] sm:$0xff]  ;;  %v102_v47 = vld [vmem:[#allocation2 + $0x10] sm:$0xff] }
  0x1a   :  { %238 = vmatpush.bf16.msra.mxu0 %v502_v3  ;;  %558 = vmatpush.bf16.msra.mxu1 %v502_v3  ;;  %v106_v48 = vld [vmem:[#allocation2 + $0x78] sm:$0xff]  ;;  %v99_v50 = vld [vmem:[#allocation2 + $0x48] sm:$0xff] }
  0x1b   :  { %559 = vmatpush.bf16.msra.mxu2 %v502_v3  ;;  %560 = vmatpush.bf16.msra.mxu3 %v502_v3  ;;  %v95_v49 = vld [vmem:[#allocation2 + $0x18] sm:$0xff]  ;;  %v107_v60 = vld [vmem:[#allocation2 + $0x28] sm:$0xff] }
  0x1c   :  { %v103_v59 = vld [vmem:[#allocation2 + $0x38] sm:$0xff] }
  0x1e   :  { %239 = vmatpush.bf16.msra.mxu0 %v501_v4  ;;  %561 = vmatpush.bf16.msra.mxu1 %v501_v4 }
  0x1f   :  { %562 = vmatpush.bf16.msra.mxu2 %v501_v4  ;;  %563 = vmatpush.bf16.msra.mxu3 %v501_v4 }
  0x22   :  { %240 = vmatpush.bf16.msra.mxu0 %v500_v5  ;;  %564 = vmatpush.bf16.msra.mxu1 %v500_v5 }
  0x23   :  { %565 = vmatpush.bf16.msra.mxu2 %v500_v5  ;;  %566 = vmatpush.bf16.msra.mxu3 %v500_v5 }
  0x26   :  { %241 = vmatpush.bf16.msra.mxu0 %v499_v6  ;;  %567 = vmatpush.bf16.msra.mxu1 %v499_v6 }
  0x27   :  { %568 = vmatpush.bf16.msra.mxu2 %v499_v6  ;;  %569 = vmatpush.bf16.msra.mxu3 %v499_v6 }
  0x2a   :  { %242 = vmatpush.bf16.msra.mxu0 %v498_v7  ;;  %570 = vmatpush.bf16.msra.mxu1 %v498_v7 }
  0x2b   :  { %571 = vmatpush.bf16.msra.mxu2 %v498_v7  ;;  %572 = vmatpush.bf16.msra.mxu3 %v498_v7 }
  0x2e   :  { %243 = vmatpush.bf16.msra.mxu0 %v497_v8  ;;  %573 = vmatpush.bf16.msra.mxu1 %v497_v8 }
  0x2f   :  { %574 = vmatpush.bf16.msra.mxu2 %v497_v8  ;;  %575 = vmatpush.bf16.msra.mxu3 %v497_v8 }
  0x31   :  { %244 = vmatmul.bf16.vlgmr.msra.gmra.mxu0 %v489_v9  ;;  %254 = vmatmul.bf16.vlgmr.msra.gmra.mxu1 %v491_v10 }
  0x32   :  { %264 = vmatmul.bf16.vlgmr.msra.gmra.mxu2 %v493_v11  ;;  %274 = vmatmul.bf16.vlgmr.msra.gmra.mxu3 %v495_v12 }
  0x41   :  { %249 = vmatmul.bf16.gmra.mxu0 %v490_v13  ;;  %259 = vmatmul.bf16.gmra.mxu1 %v492_v14 }
  0x42   :  { %269 = vmatmul.bf16.gmra.mxu2 %v494_v15  ;;  %279 = vmatmul.bf16.gmra.mxu3 %v496_v16 }
  0xae   :  { %v245_v19 = vpop.f32.mrf.mxu0  ;;  %v255_v20 = vpop.f32.mrf.mxu1 }
  0xaf   :  { %v285_v21 = vadd.f32 %v245_v19, %v92_v17  ;;  %v289_v22 = vadd.f32 %v255_v20, %v96_v18 }
  0xb1   :  { %301 = vst [vmem:[#allocation2 + $0x30] sm:$0xff] %v285_v21 }
  0xb2   :  { %305 = vst [vmem:[#allocation2 + $0x50] sm:$0xff] %v289_v22 }
  0xb5   :  { %v265_v27 = vpop.f32.mrf.mxu2  ;;  %v275_v28 = vpop.f32.mrf.mxu3 }
  0xb6   :  { %v293_v29 = vadd.f32 %v265_v27, %v100_v23  ;;  %v297_v30 = vadd.f32 %v275_v28, %v104_v24  ;;  %v247_v31 = vpop.f32.mrf.mxu0  ;;  %v257_v32 = vpop.f32.mrf.mxu1 }
  0xb7   :  { %v286_v33 = vadd.f32 %v247_v31, %v93_v25  ;;  %v290_v34 = vadd.f32 %v257_v32, %v97_v26 }
  0xb8   :  { %309 = vst [vmem:[#allocation2 + $0x40] sm:$0xff] %v293_v29 }
  0xb9   :  { %313 = vst [vmem:[#allocation2 + $0x60] sm:$0xff] %v297_v30 }
  0xba   :  { %302 = vst [vmem:[#allocation2] sm:$0xff] %v286_v33 }
  0xbb   :  { %306 = vst [vmem:[#allocation2 + $0x68] sm:$0xff] %v290_v34 }
  0xbd   :  { %v267_v39 = vpop.f32.mrf.mxu2  ;;  %v277_v40 = vpop.f32.mrf.mxu3 }
  0xbe   :  { %v294_v41 = vadd.f32 %v267_v39, %v101_v35  ;;  %v298_v42 = vadd.f32 %v277_v40, %v105_v36  ;;  %v250_v43 = vpop.f32.mrf.mxu0  ;;  %v260_v44 = vpop.f32.mrf.mxu1 }
  0xbf   :  { %v287_v45 = vadd.f32 %v250_v43, %v94_v37  ;;  %v291_v46 = vadd.f32 %v260_v44, %v98_v38 }
  0xc0   :  { %310 = vst [vmem:[#allocation2 + $0x20] sm:$0xff] %v294_v41 }
  0xc1   :  { %314 = vst [vmem:[#allocation2 + $0x70] sm:$0xff] %v298_v42 }
  0xc2   :  { %303 = vst [vmem:[#allocation2 + $0x58] sm:$0xff] %v287_v45 }
  0xc3   :  { %307 = vst [vmem:[#allocation2 + $0x8] sm:$0xff] %v291_v46 }
  0xc5   :  { %v270_v51 = vpop.f32.mrf.mxu2  ;;  %v280_v52 = vpop.f32.mrf.mxu3 }
  0xc6   :  { %v295_v53 = vadd.f32 %v270_v51, %v102_v47  ;;  %v299_v54 = vadd.f32 %v280_v52, %v106_v48  ;;  %v252_v55 = vpop.f32.mrf.mxu0  ;;  %v262_v56 = vpop.f32.mrf.mxu1 }
  0xc7   :  { %v288_v57 = vadd.f32 %v252_v55, %v95_v49  ;;  %v292_v58 = vadd.f32 %v262_v56, %v99_v50 }
  0xc8   :  { %311 = vst [vmem:[#allocation2 + $0x10] sm:$0xff] %v295_v53 }
  0xc9   :  { %315 = vst [vmem:[#allocation2 + $0x78] sm:$0xff] %v299_v54 }
  0xca   :  { %304 = vst [vmem:[#allocation2 + $0x18] sm:$0xff] %v288_v57 }
  0xcb   :  { %308 = vst [vmem:[#allocation2 + $0x48] sm:$0xff] %v292_v58 }
  0xcd   :  { %v272_v61 = vpop.f32.mrf.mxu2  ;;  %v282_v62 = vpop.f32.mrf.mxu3 }
  0xce   :  { %v296_v63 = vadd.f32 %v272_v61, %v103_v59  ;;  %v300_v0 = vadd.f32 %v282_v62, %v107_v60 }
  0xd0   :  { %312 = vst [vmem:[#allocation2 + $0x38] sm:$0xff] %v296_v63 }
  0xd1   :  { %316 = vst [vmem:[#allocation2 + $0x28] sm:$0xff] %v300_v0 }
  0xd2 PF:  { %v320_v1 = vld [vmem:[#allocation2 + $0x30] sm:$0xff]  ;;  %v321_v2 = vld [vmem:[#allocation2] sm:$0xff]  ;;  %v322_v4 = vld [vmem:[#allocation2 + $0x58] sm:$0xff] }
  0xd3   :  { %v577_v3 = vld [vmem:[%s676_s4] ss:$0 sm:$0xff]  ;;  %v323_v5 = vld [vmem:[#allocation2 + $0x18] sm:$0xff]  ;;  %v324_v6 = vld [vmem:[#allocation2 + $0x50] sm:$0xff] }
  0xd4   :  { %v325_v7 = vld [vmem:[#allocation2 + $0x68] sm:$0xff]  ;;  %v340_v9 = vadd.f32 %v577_v3, %v320_v1  ;;  %v341_v10 = vadd.f32 %v577_v3, %v321_v2  ;;  %v342_v11 = vadd.f32 %v577_v3, %v322_v4  ;;  %v343_v12 = vadd.f32 %v577_v3, %v323_v5  ;;  %v328_v18 = vld [vmem:[#allocation2 + $0x40] sm:$0xff]  ;;  %v330_v24 = vld [vmem:[#allocation2 + $0x10] sm:$0xff] }
  0xd5   :  { %v326_v8 = vld [vmem:[#allocation2 + $0x8] sm:$0xff]  ;;  %v344_v14 = vadd.f32 %v577_v3, %v324_v6  ;;  %v345_v15 = vadd.f32 %v577_v3, %v325_v7  ;;  %v329_v19 = vld [vmem:[#allocation2 + $0x20] sm:$0xff]  ;;  %v348_v34 = vadd.f32 %v577_v3, %v328_v18  ;;  %v350_v40 = vadd.f32 %v577_v3, %v330_v24 }
  0xd6   :  { %v327_v13 = vld [vmem:[#allocation2 + $0x48] sm:$0xff]  ;;  %v346_v16 = vadd.f32 %v577_v3, %v326_v8  ;;  %v356_v20 = vmax.f32 %v340_v9, 0.0  ;;  %v357_v21 = vmax.f32 %v341_v10, 0.0  ;;  %v358_v22 = vmax.f32 %v342_v11, 0.0  ;;  %v332_v30 = vld [vmem:[#allocation2 + $0x60] sm:$0xff]  ;;  %v333_v31 = vld [vmem:[#allocation2 + $0x70] sm:$0xff] }
  0xd7   :  { %v347_v17 = vadd.f32 %v577_v3, %v327_v13  ;;  %v359_v23 = vmax.f32 %v343_v12, 0.0  ;;  %v331_v25 = vld [vmem:[#allocation2 + $0x38] sm:$0xff]  ;;  %v360_v26 = vmax.f32 %v344_v14, 0.0  ;;  %v361_v27 = vmax.f32 %v345_v15, 0.0 }
  0xd8   :  { %v362_v28 = vmax.f32 %v346_v16, 0.0  ;;  %v508_v32 = vpack.c.bf16 %v357_v21, %v356_v20  ;;  %v349_v35 = vadd.f32 %v577_v3, %v329_v19  ;;  %v334_v36 = vld [vmem:[#allocation2 + $0x78] sm:$0xff]  ;;  %v335_v37 = vld [vmem:[#allocation2 + $0x28] sm:$0xff]  ;;  %v351_v41 = vadd.f32 %v577_v3, %v331_v25 }
  0xd9   :  { %v363_v29 = vmax.f32 %v347_v17, 0.0  ;;  %v513_v33 = vpack.c.bf16 %v359_v23, %v358_v22  ;;  %v518_v38 = vpack.c.bf16 %v361_v27, %v360_v26  ;;  %v364_v42 = vmax.f32 %v348_v34, 0.0 }
  0xda   :  { %509 = vst [vmem:[%s677_s5] sm:$0xff] %v508_v32   ;;  %v365_v43 = vmax.f32 %v349_v35, 0.0  ;;  %v352_v44 = vadd.f32 %v577_v3, %v332_v30  ;;  %v353_v45 = vadd.f32 %v577_v3, %v333_v31  ;;  %v366_v46 = vmax.f32 %v350_v40, 0.0 }
  0xdb   :  { %v523_v39 = vpack.c.bf16 %v363_v29, %v362_v28  ;;  %545 = vst [vmem:[%s677_s5 + $0x8] sm:$0xff] %v513_v33   ;;  %v367_v47 = vmax.f32 %v351_v41, 0.0  ;;  %v354_v48 = vadd.f32 %v577_v3, %v334_v36  ;;  %v355_v49 = vadd.f32 %v577_v3, %v335_v37 }
  0xdc   :  { %546 = vst [vmem:[%s677_s5 + $0x10] sm:$0xff] %v518_v38   ;;  %v528_v50 = vpack.c.bf16 %v365_v43, %v364_v42  ;;  %v368_v51 = vmax.f32 %v352_v44, 0.0  ;;  %v369_v52 = vmax.f32 %v353_v45, 0.0 }
  0xdd   :  { %547 = vst [vmem:[%s677_s5 + $0x18] sm:$0xff] %v523_v39   ;;  %v533_v53 = vpack.c.bf16 %v367_v47, %v366_v46  ;;  %v370_v54 = vmax.f32 %v354_v48, 0.0  ;;  %v371_v55 = vmax.f32 %v355_v49, 0.0 }
  0xde   :  { %548 = vst [vmem:[%s677_s5 + $0x20] sm:$0xff] %v528_v50   ;;  %v538_v56 = vpack.c.bf16 %v369_v52, %v368_v51 }
  0xdf   :  { %549 = vst [vmem:[%s677_s5 + $0x28] sm:$0xff] %v533_v53   ;;  %v543_v57 = vpack.c.bf16 %v371_v55, %v370_v54 }
  0xe0   :  { %550 = vst [vmem:[%s677_s5 + $0x30] sm:$0xff] %v538_v56  }
  0xe1   :  { %551 = vst [vmem:[%s677_s5 + $0x38] sm:$0xff] %v543_v57  }

// kernel: _bu_rumor_gcn_core.9
= control target key start
LH: loop header
LB: loop body
LE: loop exit
PB: predicated region body
PF: predicated region fallthrough
CT: control target
= control target key end

     0   :  { %s189_s1 = inlined_call_operand.vmem [shape: bf16[128,256], index: 1, kind: input, shape index: {}]   ;;  %s190_s0 = inlined_call_operand.vmem [shape: f32[8,128], index: 0, kind: input, shape index: {}]   ;;  %s191_s2 = inlined_call_operand.vmem [shape: f32[8,256], index: 2, kind: output, shape index: {}]  }
   0x1   :  { %v35_v0 = vld [vmem:[%s189_s1 + $0x78] sm:$0xff]  ;;  %v34_v1 = vld [vmem:[%s189_s1 + $0x70] sm:$0xff]  ;;  %v33_v2 = vld [vmem:[%s189_s1 + $0x68] sm:$0xff] }
   0x2   :  { %v66_v3 = vunpack.c.l.bf16 %v35_v0  ;;  %v67_v4 = vunpack.c.h.bf16 %v35_v0  ;;  %v64_v5 = vunpack.c.l.bf16 %v34_v1  ;;  %v65_v6 = vunpack.c.h.bf16 %v34_v1  ;;  %v32_v7 = vld [vmem:[%s189_s1 + $0x60] sm:$0xff]  ;;  %v31_v10 = vld [vmem:[%s189_s1 + $0x58] sm:$0xff]  ;;  %v30_v13 = vld [vmem:[%s189_s1 + $0x50] sm:$0xff] }
   0x3   :  { %v62_v8 = vunpack.c.l.bf16 %v33_v2  ;;  %v63_v9 = vunpack.c.h.bf16 %v33_v2  ;;  %v60_v11 = vunpack.c.l.bf16 %v32_v7  ;;  %v61_v12 = vunpack.c.h.bf16 %v32_v7  ;;  %v29_v16 = vld [vmem:[%s189_s1 + $0x48] sm:$0xff]  ;;  %v28_v19 = vld [vmem:[%s189_s1 + $0x40] sm:$0xff]  ;;  %v27_v22 = vld [vmem:[%s189_s1 + $0x38] sm:$0xff] }
   0x4   :  { %68 = vmatpush.msra.mxu0 %v66_v3  ;;  %88 = vmatpush.msra.mxu1 %v67_v4  ;;  %v58_v14 = vunpack.c.l.bf16 %v31_v10  ;;  %v59_v15 = vunpack.c.h.bf16 %v31_v10  ;;  %v56_v17 = vunpack.c.l.bf16 %v30_v13  ;;  %v57_v18 = vunpack.c.h.bf16 %v30_v13  ;;  %v26_v25 = vld [vmem:[%s189_s1 + $0x30] sm:$0xff]  ;;  %v25_v28 = vld [vmem:[%s189_s1 + $0x28] sm:$0xff]  ;;  %v24_v31 = vld [vmem:[%s189_s1 + $0x20] sm:$0xff] }
   0x5   :  { %v54_v20 = vunpack.c.l.bf16 %v29_v16  ;;  %v55_v21 = vunpack.c.h.bf16 %v29_v16  ;;  %v52_v23 = vunpack.c.l.bf16 %v28_v19  ;;  %v53_v24 = vunpack.c.h.bf16 %v28_v19  ;;  %v23_v34 = vld [vmem:[%s189_s1 + $0x18] sm:$0xff]  ;;  %v22_v37 = vld [vmem:[%s189_s1 + $0x10] sm:$0xff]  ;;  %v21_v40 = vld [vmem:[%s189_s1 + $0x8] sm:$0xff] }
   0x6   :  { %69 = vmatpush.msra.mxu0 %v64_v5  ;;  %89 = vmatpush.msra.mxu1 %v65_v6  ;;  %v50_v26 = vunpack.c.l.bf16 %v27_v22  ;;  %v51_v27 = vunpack.c.h.bf16 %v27_v22  ;;  %v48_v29 = vunpack.c.l.bf16 %v26_v25  ;;  %v49_v30 = vunpack.c.h.bf16 %v26_v25  ;;  %v20_v43 = vld [vmem:[%s189_s1] sm:$0xff] }
   0x7   :  { %v46_v32 = vunpack.c.l.bf16 %v25_v28  ;;  %v47_v33 = vunpack.c.h.bf16 %v25_v28  ;;  %v44_v35 = vunpack.c.l.bf16 %v24_v31  ;;  %v45_v36 = vunpack.c.h.bf16 %v24_v31  ;;  %v19_v48 = vld [vmem:[%s190_s0] sm:$0xff] }
   0x8   :  { %70 = vmatpush.msra.mxu0 %v62_v8  ;;  %90 = vmatpush.msra.mxu1 %v63_v9  ;;  %v42_v38 = vunpack.c.l.bf16 %v23_v34  ;;  %v43_v39 = vunpack.c.h.bf16 %v23_v34  ;;  %v40_v41 = vunpack.c.l.bf16 %v22_v37  ;;  %v41_v42 = vunpack.c.h.bf16 %v22_v37 }
   0x9   :  { %v38_v44 = vunpack.c.l.bf16 %v21_v40  ;;  %v39_v45 = vunpack.c.h.bf16 %v21_v40  ;;  %v36_v46 = vunpack.c.l.bf16 %v20_v43  ;;  %v37_v47 = vunpack.c.h.bf16 %v20_v43 }
   0xa   :  { %71 = vmatpush.msra.mxu0 %v60_v11  ;;  %91 = vmatpush.msra.mxu1 %v61_v12 }
   0xc   :  { %72 = vmatpush.msra.mxu0 %v58_v14  ;;  %92 = vmatpush.msra.mxu1 %v59_v15 }
   0xe   :  { %73 = vmatpush.msra.mxu0 %v56_v17  ;;  %93 = vmatpush.msra.mxu1 %v57_v18 }
  0x10   :  { %74 = vmatpush.msra.mxu0 %v54_v20  ;;  %94 = vmatpush.msra.mxu1 %v55_v21 }
  0x12   :  { %75 = vmatpush.msra.mxu0 %v52_v23  ;;  %95 = vmatpush.msra.mxu1 %v53_v24 }
  0x14   :  { %76 = vmatpush.msra.mxu0 %v50_v26  ;;  %96 = vmatpush.msra.mxu1 %v51_v27 }
  0x16   :  { %77 = vmatpush.msra.mxu0 %v48_v29  ;;  %97 = vmatpush.msra.mxu1 %v49_v30 }
  0x18   :  { %78 = vmatpush.msra.mxu0 %v46_v32  ;;  %98 = vmatpush.msra.mxu1 %v47_v33 }
  0x1a   :  { %79 = vmatpush.msra.mxu0 %v44_v35  ;;  %99 = vmatpush.msra.mxu1 %v45_v36 }
  0x1c   :  { %80 = vmatpush.msra.mxu0 %v42_v38  ;;  %100 = vmatpush.msra.mxu1 %v43_v39 }
  0x1e   :  { %81 = vmatpush.msra.mxu0 %v40_v41  ;;  %101 = vmatpush.msra.mxu1 %v41_v42 }
  0x20   :  { %82 = vmatpush.msra.mxu0 %v38_v44  ;;  %102 = vmatpush.msra.mxu1 %v39_v45 }
  0x22   :  { %83 = vmatpush.msra.mxu0 %v36_v46  ;;  %103 = vmatpush.msra.mxu1 %v37_v47 }
  0x23   :  { %84 = vmatmul.f32.vlgmr.msra.gmra.mxu0 %v19_v48  ;;  %104 = vmatmul.f32.vlgmr.msra.gmra.mxu1 %v19_v48 }
  0xa0   :  { %v85_v49 = vpop.f32.mrf.mxu0  ;;  %v105_v50 = vpop.f32.mrf.mxu1 }
  0xa1   :  { %110 = vst [vmem:[%s191_s2] sm:$0xff] %v85_v49 }
  0xa2   :  { %111 = vst [vmem:[%s191_s2 + $0x8] sm:$0xff] %v105_v50 }

</bundles_post_ra>
